<compile_context>
chip_gen: v7x
topology: tpu7x:2x2x1
jax: 0.10.0
libtpu: 0.0.40
codegen_flags: <defaults>
</compile_context>

<pallas_src>
import functools

import numpy as np
import jax
import jax.numpy as jnp
from jax.experimental import pallas as pl
from jax.experimental.pallas import tpu as pltpu

# ---- model hyper-params (small, consistent with the module's forward) ----
VOCAB = 64
VOCAB_PAD = 128          # lane-dense lm_head output width
N_EMBD = 32
BLOCK_SIZE = 8           # max sequence length T
N_HEADS = 4
HEAD_SIZE = N_EMBD // N_HEADS
N_LAYER = 2
BATCH = 2
EPS = 1e-5               # nn.LayerNorm default

EXACT_SOFTMAX = False    # True -> exact divide in softmax normalization


def _norm(x):
    """LayerNorm WITHOUT affine (gamma/beta folded into downstream weights)."""
    mu = jnp.mean(x, axis=-1, keepdims=True)
    xc = x - mu
    var = jnp.mean(xc * xc, axis=-1, keepdims=True)
    return xc * jax.lax.rsqrt(var + EPS)


def _layernorm(x, g, b):
    """Full PyTorch LayerNorm (used only by the pure-JAX reference)."""
    mu = jnp.mean(x, axis=-1, keepdims=True)
    var = jnp.mean((x - mu) ** 2, axis=-1, keepdims=True)
    return (x - mu) * jax.lax.rsqrt(var + EPS) * g + b


# ---------------------------------------------------------------------------
# Single fused Pallas kernel: embeddings -> N blocks -> final LN -> lm_head
# ---------------------------------------------------------------------------
def decoder_kernel(idx_ref, emb_ref, mask_ref, wqkv_ref, wproj_ref, w1_ref,
                   w2_ref, bias_ref, wlm_ref, blm_ref, out_ref, ctx_ref,
                   *, batch, seqlen, n_layer):
    B, T, C, H, HS = batch, seqlen, N_EMBD, N_HEADS, HEAD_SIZE
    BT = B * T
    f32, bf16 = jnp.float32, jnp.bfloat16

    # ---- token + position embedding as ONE two-hot matmul ----
    # row r carries 1.0 at column ids[r] and at column VOCAB + t(r); the
    # merged table is [tok_emb; pos_emb], so a single dot does gather + add.
    ids = idx_ref[:, 0:1]                                   # (BT, 1) int32
    pos = idx_ref[:, 1:2]                                   # (BT, 1) int32
    cols = jax.lax.broadcasted_iota(jnp.int32, (BT, VOCAB + BLOCK_SIZE), 1)
    hot = jnp.where((cols == ids) | (cols == pos), 1.0, 0.0).astype(bf16)
    x = jnp.dot(hot, emb_ref[...], preferred_element_type=f32)       # (BT, C)

    # static additive mask: 0 where (same sequence AND causal), else -1e30
    mask_add = mask_ref[...]                                # (BT, BT) f32

    # ---- transformer blocks (statically unrolled; weights stacked on dim 0) ----
    for l in range(n_layer):
        biases = bias_ref[l]                                # (4, 4C) f32
        bqkv = biases[0:1, :3 * C]                          # (1, 3C)
        bproj = biases[1:2, :C]                             # (1, C)
        b1 = biases[2:3, :]                                 # (1, 4C)
        b2 = biases[3:4, :C]                                # (1, C)

        # fused QKV projection (LN1 affine + n_embd**-0.5 scale folded in)
        xn = _norm(x).astype(bf16)
        qkv = jnp.dot(xn, wqkv_ref[l], preferred_element_type=f32) + bqkv
        kT = qkv[:, C:2 * C].T                              # (C, BT): ONE transpose/layer

        # multi-head causal self-attention; per-head context written into lane
        # slots of a single (BT, C) scratch -> ONE projection matmul per layer.
        for h in range(H):                                  # static unroll
            lo = h * HS
            s = jnp.dot(qkv[:, lo:lo + HS], kT[lo:lo + HS, :],
                        preferred_element_type=f32)         # (BT, BT)
            s = s + mask_add
            s = s - jnp.max(s, axis=-1, keepdims=True)
            p = jnp.exp(s)
            denom = jnp.sum(p, axis=-1, keepdims=True)
            if EXACT_SOFTMAX:
                p = p / denom
            else:
                p = p * pl.reciprocal(denom, approx=True)
            ctx_ref[:, lo:lo + HS] = jnp.dot(
                p, qkv[:, 2 * C + lo:2 * C + lo + HS],
                preferred_element_type=f32)                 # (BT, HS)

        attn = jnp.dot(ctx_ref[...].astype(bf16), wproj_ref[l],
                       preferred_element_type=f32)          # (BT, C)
        x = x + attn + bproj                                # residual 1

        # feed-forward (LN2 affine folded into w1/b1)
        xn2 = _norm(x).astype(bf16)
        hdn = jnp.maximum(
            jnp.dot(xn2, w1_ref[l], preferred_element_type=f32) + b1, 0.0)
        x = x + jnp.dot(hdn.astype(bf16), w2_ref[l],
                        preferred_element_type=f32) + b2    # residual 2
        # dropout layers are identity (p = 0 / eval mode)

    # ---- final LayerNorm + lm_head (lnf affine folded; vocab padded to 128) ----
    xnf = _norm(x).astype(bf16)
    logits = jnp.dot(xnf, wlm_ref[...], preferred_element_type=f32) + blm_ref[...]
    out_ref[...] = logits.astype(out_ref.dtype)             # (BT, VOCAB_PAD)


# ---------------------------------------------------------------------------
# Wrapper
# ---------------------------------------------------------------------------
def decoder_forward(idx, kp):
    """idx: (B, T) int32 token ids. Returns (logits (B,T,VOCAB), None)."""
    B, T = idx.shape
    BT = B * T
    n_layer = kp['wqkv'].shape[0]

    # static-per-(B,T) auxiliary inputs (built with numpy at trace time)
    rows = np.arange(BT)
    pos_col = (VOCAB + rows % T).astype(np.int32)           # merged-table index
    same_seq = (rows[None, :] // T) == (rows[:, None] // T)
    causal = rows[None, :] <= rows[:, None]
    mask_add = jnp.asarray(
        np.where(same_seq & causal, 0.0, -1e30).astype(np.float32))  # (BT, BT)

    idx2 = jnp.stack([idx.reshape(BT).astype(jnp.int32),
                      jnp.asarray(pos_col)], axis=1)        # (BT, 2)

    kernel = functools.partial(decoder_kernel, batch=B, seqlen=T,
                               n_layer=n_layer)
    args = (idx2, kp['emb'], mask_add, kp['wqkv'], kp['wproj'], kp['w1'],
            kp['w2'], kp['bias'], kp['w_lm'], kp['b_lm'])
    out = pl.pallas_call(
        kernel,
        out_shape=jax.ShapeDtypeStruct((BT, VOCAB_PAD), jnp.float32),
        in_specs=[pl.BlockSpec(memory_space=pltpu.MemorySpace.VMEM)] * len(args),
        out_specs=pl.BlockSpec(memory_space=pltpu.MemorySpace.VMEM),
        scratch_shapes=[pltpu.VMEM((BT, N_EMBD), jnp.float32)],
    )(*args)
    logits = out[:, :VOCAB].reshape(B, T, VOCAB)
    return logits, None


# ---------------------------------------------------------------------------
# Parameter init (natural layout) and one-time prep into kernel layout
# ---------------------------------------------------------------------------
def init_params(key):
    def nrm(k, shape, std=0.02):
        return (std * jax.random.normal(k, shape)).astype(jnp.float32)

    keys = iter(jax.random.split(key, 64))
    params = {
        'tok_emb': nrm(next(keys), (VOCAB, N_EMBD), 1.0),
        'pos_emb': nrm(next(keys), (BLOCK_SIZE, N_EMBD), 1.0),
        'lnf_g': jnp.ones((1, N_EMBD), jnp.float32),
        'lnf_b': jnp.zeros((1, N_EMBD), jnp.float32),
        'w_lm': nrm(next(keys), (N_EMBD, VOCAB)),
        'b_lm': jnp.zeros((1, VOCAB), jnp.float32),
        'blocks': [],
    }
    for _ in range(N_LAYER):
        blk = {
            'ln1_g': jnp.ones((1, N_EMBD), jnp.float32),
            'ln1_b': jnp.zeros((1, N_EMBD), jnp.float32),
            'wq': nrm(next(keys), (N_EMBD, N_EMBD)),
            'wk': nrm(next(keys), (N_EMBD, N_EMBD)),
            'wv': nrm(next(keys), (N_EMBD, N_EMBD)),
            'wproj': nrm(next(keys), (N_EMBD, N_EMBD)),
            'bproj': jnp.zeros((1, N_EMBD), jnp.float32),
            'ln2_g': jnp.ones((1, N_EMBD), jnp.float32),
            'ln2_b': jnp.zeros((1, N_EMBD), jnp.float32),
            'w1': nrm(next(keys), (N_EMBD, 4 * N_EMBD)),
            'b1': jnp.zeros((1, 4 * N_EMBD), jnp.float32),
            'w2': nrm(next(keys), (4 * N_EMBD, N_EMBD)),
            'b2': jnp.zeros((1, N_EMBD), jnp.float32),
        }
        params['blocks'].append(blk)
    return params


def prepare_params(p):
    """One-time pack: fold LN affines + attention scale, stack layers, pad, bf16."""
    scale = N_EMBD ** (-0.5)          # reference scales scores by n_embd**-0.5
    bf16 = jnp.bfloat16
    wqkv, wproj, w1, w2, bias = [], [], [], [], []
    for blk in p['blocks']:
        wqkv_l = jnp.concatenate([blk['wq'] * scale, blk['wk'], blk['wv']],
                                 axis=1)                                 # (C,3C)
        # fold LN1 gamma/beta into wqkv / a qkv bias
        wqkv.append((blk['ln1_g'][0][:, None] * wqkv_l).astype(bf16))
        bqkv = (blk['ln1_b'] @ wqkv_l)[0]                                # (3C,)
        wproj.append(blk['wproj'].astype(bf16))
        # fold LN2 gamma/beta into w1 / b1
        w1.append((blk['ln2_g'][0][:, None] * blk['w1']).astype(bf16))
        b1 = (blk['ln2_b'] @ blk['w1'] + blk['b1'])[0]                   # (4C,)
        w2.append(blk['w2'].astype(bf16))
        # one packed (4, 4C) f32 bias slab per layer: [bqkv | bproj | b1 | b2]
        slab = jnp.zeros((4, 4 * N_EMBD), jnp.float32)
        slab = slab.at[0, :3 * N_EMBD].set(bqkv)
        slab = slab.at[1, :N_EMBD].set(blk['bproj'][0])
        slab = slab.at[2, :].set(b1)
        slab = slab.at[3, :N_EMBD].set(blk['b2'][0])
        bias.append(slab)

    # merged embedding table for the two-hot gather matmul
    emb = jnp.concatenate([p['tok_emb'], p['pos_emb']], axis=0).astype(bf16)

    # fold final LayerNorm affine into lm_head; pad vocab to 128 lanes
    w_lm = p['lnf_g'][0][:, None] * p['w_lm']
    b_lm = p['lnf_b'] @ p['w_lm'] + p['b_lm']
    w_lm_pad = jnp.zeros((N_EMBD, VOCAB_PAD), jnp.float32
                         ).at[:, :VOCAB].set(w_lm).astype(bf16)
    b_lm_pad = jnp.zeros((1, VOCAB_PAD), jnp.float32).at[:, :VOCAB].set(b_lm)

    return {
        'emb': emb,                      # (VOCAB+BLOCK_SIZE, C) bf16
        'wqkv': jnp.stack(wqkv),         # (L, C, 3C) bf16
        'wproj': jnp.stack(wproj),       # (L, C, C)  bf16
        'w1': jnp.stack(w1),             # (L, C, 4C) bf16
        'w2': jnp.stack(w2),             # (L, 4C, C) bf16
        'bias': jnp.stack(bias),         # (L, 4, 4C) f32
        'w_lm': w_lm_pad,                # (C, 128)   bf16
        'b_lm': b_lm_pad,                # (1, 128)   f32
    }


# ---------------------------------------------------------------------------
# Pure-JAX reference (for correctness check only)
# ---------------------------------------------------------------------------
def _ref_forward(idx, params):
    tok = jnp.take(params['tok_emb'], idx, axis=0)
    x = tok + params['pos_emb'][:idx.shape[1]][None]
    C = N_EMBD
    hs = C // N_HEADS
    T = idx.shape[1]
    causal = jnp.tril(jnp.ones((T, T), bool))
    for p in params['blocks']:
        xn = _layernorm(x, p['ln1_g'], p['ln1_b'])
        q = xn @ p['wq']; k = xn @ p['wk']; v = xn @ p['wv']
        outs = []
        for h in range(N_HEADS):
            qh, kh, vh = (a[:, :, h*hs:(h+1)*hs] for a in (q, k, v))
            s = jnp.einsum('btd,bsd->bts', qh, kh) * C ** (-0.5)
            s = jnp.where(causal[None], s, -jnp.inf)
            w = jax.nn.softmax(s, axis=-1)
            outs.append(jnp.einsum('bts,bsd->btd', w, vh))
        x = x + (jnp.concatenate(outs, -1) @ p['wproj'] + p['bproj'])
        xn2 = _layernorm(x, p['ln2_g'], p['ln2_b'])
        x = x + (jnp.maximum(xn2 @ p['w1'] + p['b1'], 0.0) @ p['w2'] + p['b2'])
    xn = _layernorm(x, params['lnf_g'], params['lnf_b'])
    return xn @ params['w_lm'] + params['b_lm']


if __name__ == "__main__":
    key = jax.random.PRNGKey(0)
    pkey, ikey = jax.random.split(key)
    params = init_params(pkey)
    kparams = prepare_params(params)
    idx = jax.random.randint(ikey, (BATCH, BLOCK_SIZE), 0, VOCAB, dtype=jnp.int32)

    logits, loss = decoder_forward(idx, kparams)
    logits = jax.block_until_ready(logits)
    assert logits.shape == (BATCH, BLOCK_SIZE, VOCAB)
    assert loss is None

    ref = _ref_forward(idx, params)
    # bf16 weight storage + approx reciprocal -> slightly looser tolerance
    assert jnp.allclose(logits, ref, rtol=1e-2, atol=1e-2), "mismatch vs reference"

    print("KERNEL_OK")
</pallas_src>

<mosaic_0001>
module attributes {stable_mosaic.version = 11 : i64} {
  func.func @decoder_kernel(%arg0: memref<16x2xi32, #tpu.memory_space<vmem>>, %arg1: memref<72x32xbf16, #tpu.memory_space<vmem>>, %arg2: memref<16x16xf32, #tpu.memory_space<vmem>>, %arg3: memref<2x32x96xbf16, #tpu.memory_space<vmem>>, %arg4: memref<2x32x32xbf16, #tpu.memory_space<vmem>>, %arg5: memref<2x32x128xbf16, #tpu.memory_space<vmem>>, %arg6: memref<2x128x32xbf16, #tpu.memory_space<vmem>>, %arg7: memref<2x4x128xf32, #tpu.memory_space<vmem>>, %arg8: memref<32x128xbf16, #tpu.memory_space<vmem>>, %arg9: memref<1x128xf32, #tpu.memory_space<vmem>>, %arg10: memref<16x128xf32, #tpu.memory_space<vmem>>, %arg11: memref<16x32xf32, #tpu.memory_space<vmem>>) attributes {dimension_semantics = [], scalar_prefetch = 0 : i64, scratch_operands = 1 : i64, tpu.core_type = #tpu.core_type<tc>} {
    %c0 = arith.constant 0 : index
    %c0_0 = arith.constant 0 : index
    %0 = vector.load %arg0[%c0, %c0_0] : memref<16x2xi32, #tpu.memory_space<vmem>>, vector<16x1xi32>
    %c0_1 = arith.constant 0 : index
    %c1 = arith.constant 1 : index
    %1 = vector.load %arg0[%c0_1, %c1] : memref<16x2xi32, #tpu.memory_space<vmem>>, vector<16x1xi32>
    %2 = tpu.iota {dimensions = array<i32: 1>} : vector<16x72xi32>
    %3 = vector.broadcast %0 : vector<16x1xi32> to vector<16x72xi32>
    %4 = arith.cmpi eq, %2, %3 : vector<16x72xi32>
    %5 = vector.broadcast %1 : vector<16x1xi32> to vector<16x72xi32>
    %6 = arith.cmpi eq, %2, %5 : vector<16x72xi32>
    %7 = arith.ori %4, %6 : vector<16x72xi1>
    %cst = arith.constant 1.000000e+00 : f32
    %cst_2 = arith.constant 0.000000e+00 : f32
    %8 = vector.broadcast %cst : f32 to vector<16x72xf32>
    %9 = vector.broadcast %cst_2 : f32 to vector<16x72xf32>
    %10 = arith.select %7, %8, %9 : vector<16x72xi1>, vector<16x72xf32>
    %11 = arith.truncf %10 : vector<16x72xf32> to vector<16x72xbf16>
    %c0_3 = arith.constant 0 : index
    %c0_4 = arith.constant 0 : index
    %12 = vector.load %arg1[%c0_3, %c0_4] : memref<72x32xbf16, #tpu.memory_space<vmem>>, vector<72x32xbf16>
    %cst_5 = arith.constant dense<0.000000e+00> : vector<16x32xf32>
    %13 = tpu.matmul %11, %12, %cst_5 {dimension_numbers = #tpu.dot_dimension_numbers<[1], [0], [0], [1], [0, 0, 1, 1], [], []>} : vector<16x72xbf16>, vector<72x32xbf16>, vector<16x32xf32> -> vector<16x32xf32>
    %c0_6 = arith.constant 0 : index
    %c0_7 = arith.constant 0 : index
    %14 = vector.load %arg2[%c0_6, %c0_7] : memref<16x16xf32, #tpu.memory_space<vmem>>, vector<16x16xf32>
    %c0_8 = arith.constant 0 : index
    %c0_9 = arith.constant 0 : index
    %c0_10 = arith.constant 0 : index
    %15 = vector.load %arg7[%c0_8, %c0_9, %c0_10] : memref<2x4x128xf32, #tpu.memory_space<vmem>>, vector<1x4x128xf32>
    %16 = vector.shape_cast %15 : vector<1x4x128xf32> to vector<4x128xf32>
    %17 = vector.extract_strided_slice %16 {offsets = [0, 0], sizes = [1, 96], strides = [1, 1]} : vector<4x128xf32> to vector<1x96xf32>
    %18 = vector.extract_strided_slice %16 {offsets = [1, 0], sizes = [1, 32], strides = [1, 1]} : vector<4x128xf32> to vector<1x32xf32>
    %19 = vector.extract_strided_slice %16 {offsets = [2, 0], sizes = [1, 128], strides = [1, 1]} : vector<4x128xf32> to vector<1x128xf32>
    %20 = vector.extract_strided_slice %16 {offsets = [3, 0], sizes = [1, 32], strides = [1, 1]} : vector<4x128xf32> to vector<1x32xf32>
    %cst_11 = arith.constant dense<0.000000e+00> : vector<16xf32>
    %21 = vector.multi_reduction <add>, %13, %cst_11 [1] : vector<16x32xf32> to vector<16xf32>
    %22 = vector.shape_cast %21 : vector<16xf32> to vector<16x1xf32>
    %cst_12 = arith.constant 3.200000e+01 : f32
    %23 = vector.broadcast %cst_12 : f32 to vector<16x1xf32>
    %24 = arith.divf %22, %23 : vector<16x1xf32>
    %25 = vector.broadcast %24 : vector<16x1xf32> to vector<16x32xf32>
    %26 = arith.subf %13, %25 : vector<16x32xf32>
    %27 = arith.mulf %26, %26 : vector<16x32xf32>
    %cst_13 = arith.constant dense<0.000000e+00> : vector<16xf32>
    %28 = vector.multi_reduction <add>, %27, %cst_13 [1] : vector<16x32xf32> to vector<16xf32>
    %29 = vector.shape_cast %28 : vector<16xf32> to vector<16x1xf32>
    %cst_14 = arith.constant 3.200000e+01 : f32
    %30 = vector.broadcast %cst_14 : f32 to vector<16x1xf32>
    %31 = arith.divf %29, %30 : vector<16x1xf32>
    %cst_15 = arith.constant 9.99999974E-6 : f32
    %32 = vector.broadcast %cst_15 : f32 to vector<16x1xf32>
    %33 = arith.addf %31, %32 : vector<16x1xf32>
    %34 = math.rsqrt %33 : vector<16x1xf32>
    %35 = vector.broadcast %34 : vector<16x1xf32> to vector<16x32xf32>
    %36 = arith.mulf %26, %35 : vector<16x32xf32>
    %37 = arith.truncf %36 : vector<16x32xf32> to vector<16x32xbf16>
    %c0_16 = arith.constant 0 : index
    %c0_17 = arith.constant 0 : index
    %c0_18 = arith.constant 0 : index
    %38 = vector.load %arg3[%c0_16, %c0_17, %c0_18] : memref<2x32x96xbf16, #tpu.memory_space<vmem>>, vector<1x32x96xbf16>
    %39 = vector.shape_cast %38 : vector<1x32x96xbf16> to vector<32x96xbf16>
    %cst_19 = arith.constant dense<0.000000e+00> : vector<16x96xf32>
    %40 = tpu.matmul %37, %39, %cst_19 {dimension_numbers = #tpu.dot_dimension_numbers<[1], [0], [0], [1], [0, 0, 1, 1], [], []>} : vector<16x32xbf16>, vector<32x96xbf16>, vector<16x96xf32> -> vector<16x96xf32>
    %41 = vector.broadcast %17 : vector<1x96xf32> to vector<16x96xf32>
    %42 = arith.addf %40, %41 : vector<16x96xf32>
    %43 = vector.extract_strided_slice %42 {offsets = [0, 32], sizes = [16, 32], strides = [1, 1]} : vector<16x96xf32> to vector<16x32xf32>
    %44 = tpu.transpose %43, [1, 0] : vector<16x32xf32> -> vector<32x16xf32>
    %45 = vector.extract_strided_slice %42 {offsets = [0, 0], sizes = [16, 8], strides = [1, 1]} : vector<16x96xf32> to vector<16x8xf32>
    %46 = vector.extract_strided_slice %44 {offsets = [0, 0], sizes = [8, 16], strides = [1, 1]} : vector<32x16xf32> to vector<8x16xf32>
    %cst_20 = arith.constant dense<0.000000e+00> : vector<16x16xf32>
    %47 = tpu.matmul %45, %46, %cst_20 {dimension_numbers = #tpu.dot_dimension_numbers<[1], [0], [0], [1], [0, 0, 1, 1], [], []>} : vector<16x8xf32>, vector<8x16xf32>, vector<16x16xf32> -> vector<16x16xf32>
    %48 = arith.addf %47, %14 : vector<16x16xf32>
    %cst_21 = arith.constant dense<0xFF800000> : vector<16xf32>
    %49 = vector.multi_reduction <maximumf>, %48, %cst_21 [1] : vector<16x16xf32> to vector<16xf32>
    %50 = vector.shape_cast %49 : vector<16xf32> to vector<16x1xf32>
    %51 = vector.broadcast %50 : vector<16x1xf32> to vector<16x16xf32>
    %52 = arith.subf %48, %51 : vector<16x16xf32>
    %53 = math.exp %52 : vector<16x16xf32>
    %cst_22 = arith.constant dense<0.000000e+00> : vector<16xf32>
    %54 = vector.multi_reduction <add>, %53, %cst_22 [1] : vector<16x16xf32> to vector<16xf32>
    %55 = vector.shape_cast %54 : vector<16xf32> to vector<16x1xf32>
    %56 = tpu.reciprocal %55 {approx = true} : vector<16x1xf32> -> vector<16x1xf32>
    %57 = vector.broadcast %56 : vector<16x1xf32> to vector<16x16xf32>
    %58 = arith.mulf %53, %57 : vector<16x16xf32>
    %59 = vector.extract_strided_slice %42 {offsets = [0, 64], sizes = [16, 8], strides = [1, 1]} : vector<16x96xf32> to vector<16x8xf32>
    %cst_23 = arith.constant dense<0.000000e+00> : vector<16x8xf32>
    %60 = tpu.matmul %58, %59, %cst_23 {dimension_numbers = #tpu.dot_dimension_numbers<[1], [0], [0], [1], [0, 0, 1, 1], [], []>} : vector<16x16xf32>, vector<16x8xf32>, vector<16x8xf32> -> vector<16x8xf32>
    %c0_24 = arith.constant 0 : index
    %c0_25 = arith.constant 0 : index
    %61 = vector.load %arg11[%c0_24, %c0_25] : memref<16x32xf32, #tpu.memory_space<vmem>>, vector<16x8xf32>
    tpu.vector_store %arg11[%c0_24, %c0_25], %60 {strides = array<i32>} : memref<16x32xf32, #tpu.memory_space<vmem>>, vector<16x8xf32>,
    %62 = vector.extract_strided_slice %42 {offsets = [0, 8], sizes = [16, 8], strides = [1, 1]} : vector<16x96xf32> to vector<16x8xf32>
    %63 = vector.extract_strided_slice %44 {offsets = [8, 0], sizes = [8, 16], strides = [1, 1]} : vector<32x16xf32> to vector<8x16xf32>
    %cst_26 = arith.constant dense<0.000000e+00> : vector<16x16xf32>
    %64 = tpu.matmul %62, %63, %cst_26 {dimension_numbers = #tpu.dot_dimension_numbers<[1], [0], [0], [1], [0, 0, 1, 1], [], []>} : vector<16x8xf32>, vector<8x16xf32>, vector<16x16xf32> -> vector<16x16xf32>
    %65 = arith.addf %64, %14 : vector<16x16xf32>
    %cst_27 = arith.constant dense<0xFF800000> : vector<16xf32>
    %66 = vector.multi_reduction <maximumf>, %65, %cst_27 [1] : vector<16x16xf32> to vector<16xf32>
    %67 = vector.shape_cast %66 : vector<16xf32> to vector<16x1xf32>
    %68 = vector.broadcast %67 : vector<16x1xf32> to vector<16x16xf32>
    %69 = arith.subf %65, %68 : vector<16x16xf32>
    %70 = math.exp %69 : vector<16x16xf32>
    %cst_28 = arith.constant dense<0.000000e+00> : vector<16xf32>
    %71 = vector.multi_reduction <add>, %70, %cst_28 [1] : vector<16x16xf32> to vector<16xf32>
    %72 = vector.shape_cast %71 : vector<16xf32> to vector<16x1xf32>
    %73 = tpu.reciprocal %72 {approx = true} : vector<16x1xf32> -> vector<16x1xf32>
    %74 = vector.broadcast %73 : vector<16x1xf32> to vector<16x16xf32>
    %75 = arith.mulf %70, %74 : vector<16x16xf32>
    %76 = vector.extract_strided_slice %42 {offsets = [0, 72], sizes = [16, 8], strides = [1, 1]} : vector<16x96xf32> to vector<16x8xf32>
    %cst_29 = arith.constant dense<0.000000e+00> : vector<16x8xf32>
    %77 = tpu.matmul %75, %76, %cst_29 {dimension_numbers = #tpu.dot_dimension_numbers<[1], [0], [0], [1], [0, 0, 1, 1], [], []>} : vector<16x16xf32>, vector<16x8xf32>, vector<16x8xf32> -> vector<16x8xf32>
    %c0_30 = arith.constant 0 : index
    %c8 = arith.constant 8 : index
    %78 = vector.load %arg11[%c0_30, %c8] : memref<16x32xf32, #tpu.memory_space<vmem>>, vector<16x8xf32>
    tpu.vector_store %arg11[%c0_30, %c8], %77 {strides = array<i32>} : memref<16x32xf32, #tpu.memory_space<vmem>>, vector<16x8xf32>,
    %79 = vector.extract_strided_slice %42 {offsets = [0, 16], sizes = [16, 8], strides = [1, 1]} : vector<16x96xf32> to vector<16x8xf32>
    %80 = vector.extract_strided_slice %44 {offsets = [16, 0], sizes = [8, 16], strides = [1, 1]} : vector<32x16xf32> to vector<8x16xf32>
    %cst_31 = arith.constant dense<0.000000e+00> : vector<16x16xf32>
    %81 = tpu.matmul %79, %80, %cst_31 {dimension_numbers = #tpu.dot_dimension_numbers<[1], [0], [0], [1], [0, 0, 1, 1], [], []>} : vector<16x8xf32>, vector<8x16xf32>, vector<16x16xf32> -> vector<16x16xf32>
    %82 = arith.addf %81, %14 : vector<16x16xf32>
    %cst_32 = arith.constant dense<0xFF800000> : vector<16xf32>
    %83 = vector.multi_reduction <maximumf>, %82, %cst_32 [1] : vector<16x16xf32> to vector<16xf32>
    %84 = vector.shape_cast %83 : vector<16xf32> to vector<16x1xf32>
    %85 = vector.broadcast %84 : vector<16x1xf32> to vector<16x16xf32>
    %86 = arith.subf %82, %85 : vector<16x16xf32>
    %87 = math.exp %86 : vector<16x16xf32>
    %cst_33 = arith.constant dense<0.000000e+00> : vector<16xf32>
    %88 = vector.multi_reduction <add>, %87, %cst_33 [1] : vector<16x16xf32> to vector<16xf32>
    %89 = vector.shape_cast %88 : vector<16xf32> to vector<16x1xf32>
    %90 = tpu.reciprocal %89 {approx = true} : vector<16x1xf32> -> vector<16x1xf32>
    %91 = vector.broadcast %90 : vector<16x1xf32> to vector<16x16xf32>
    %92 = arith.mulf %87, %91 : vector<16x16xf32>
    %93 = vector.extract_strided_slice %42 {offsets = [0, 80], sizes = [16, 8], strides = [1, 1]} : vector<16x96xf32> to vector<16x8xf32>
    %cst_34 = arith.constant dense<0.000000e+00> : vector<16x8xf32>
    %94 = tpu.matmul %92, %93, %cst_34 {dimension_numbers = #tpu.dot_dimension_numbers<[1], [0], [0], [1], [0, 0, 1, 1], [], []>} : vector<16x16xf32>, vector<16x8xf32>, vector<16x8xf32> -> vector<16x8xf32>
    %c0_35 = arith.constant 0 : index
    %c16 = arith.constant 16 : index
    %95 = vector.load %arg11[%c0_35, %c16] : memref<16x32xf32, #tpu.memory_space<vmem>>, vector<16x8xf32>
    tpu.vector_store %arg11[%c0_35, %c16], %94 {strides = array<i32>} : memref<16x32xf32, #tpu.memory_space<vmem>>, vector<16x8xf32>,
    %96 = vector.extract_strided_slice %42 {offsets = [0, 24], sizes = [16, 8], strides = [1, 1]} : vector<16x96xf32> to vector<16x8xf32>
    %97 = vector.extract_strided_slice %44 {offsets = [24, 0], sizes = [8, 16], strides = [1, 1]} : vector<32x16xf32> to vector<8x16xf32>
    %cst_36 = arith.constant dense<0.000000e+00> : vector<16x16xf32>
    %98 = tpu.matmul %96, %97, %cst_36 {dimension_numbers = #tpu.dot_dimension_numbers<[1], [0], [0], [1], [0, 0, 1, 1], [], []>} : vector<16x8xf32>, vector<8x16xf32>, vector<16x16xf32> -> vector<16x16xf32>
    %99 = arith.addf %98, %14 : vector<16x16xf32>
    %cst_37 = arith.constant dense<0xFF800000> : vector<16xf32>
    %100 = vector.multi_reduction <maximumf>, %99, %cst_37 [1] : vector<16x16xf32> to vector<16xf32>
    %101 = vector.shape_cast %100 : vector<16xf32> to vector<16x1xf32>
    %102 = vector.broadcast %101 : vector<16x1xf32> to vector<16x16xf32>
    %103 = arith.subf %99, %102 : vector<16x16xf32>
    %104 = math.exp %103 : vector<16x16xf32>
    %cst_38 = arith.constant dense<0.000000e+00> : vector<16xf32>
    %105 = vector.multi_reduction <add>, %104, %cst_38 [1] : vector<16x16xf32> to vector<16xf32>
    %106 = vector.shape_cast %105 : vector<16xf32> to vector<16x1xf32>
    %107 = tpu.reciprocal %106 {approx = true} : vector<16x1xf32> -> vector<16x1xf32>
    %108 = vector.broadcast %107 : vector<16x1xf32> to vector<16x16xf32>
    %109 = arith.mulf %104, %108 : vector<16x16xf32>
    %110 = vector.extract_strided_slice %42 {offsets = [0, 88], sizes = [16, 8], strides = [1, 1]} : vector<16x96xf32> to vector<16x8xf32>
    %cst_39 = arith.constant dense<0.000000e+00> : vector<16x8xf32>
    %111 = tpu.matmul %109, %110, %cst_39 {dimension_numbers = #tpu.dot_dimension_numbers<[1], [0], [0], [1], [0, 0, 1, 1], [], []>} : vector<16x16xf32>, vector<16x8xf32>, vector<16x8xf32> -> vector<16x8xf32>
    %c0_40 = arith.constant 0 : index
    %c24 = arith.constant 24 : index
    %112 = vector.load %arg11[%c0_40, %c24] : memref<16x32xf32, #tpu.memory_space<vmem>>, vector<16x8xf32>
    tpu.vector_store %arg11[%c0_40, %c24], %111 {strides = array<i32>} : memref<16x32xf32, #tpu.memory_space<vmem>>, vector<16x8xf32>,
    %c0_41 = arith.constant 0 : index
    %c0_42 = arith.constant 0 : index
    %113 = vector.load %arg11[%c0_41, %c0_42] : memref<16x32xf32, #tpu.memory_space<vmem>>, vector<16x32xf32>
    %114 = arith.truncf %113 : vector<16x32xf32> to vector<16x32xbf16>
    %c0_43 = arith.constant 0 : index
    %c0_44 = arith.constant 0 : index
    %c0_45 = arith.constant 0 : index
    %115 = vector.load %arg4[%c0_43, %c0_44, %c0_45] : memref<2x32x32xbf16, #tpu.memory_space<vmem>>, vector<1x32x32xbf16>
    %116 = vector.shape_cast %115 : vector<1x32x32xbf16> to vector<32x32xbf16>
    %cst_46 = arith.constant dense<0.000000e+00> : vector<16x32xf32>
    %117 = tpu.matmul %114, %116, %cst_46 {dimension_numbers = #tpu.dot_dimension_numbers<[1], [0], [0], [1], [0, 0, 1, 1], [], []>} : vector<16x32xbf16>, vector<32x32xbf16>, vector<16x32xf32> -> vector<16x32xf32>
    %118 = arith.addf %13, %117 : vector<16x32xf32>
    %119 = vector.broadcast %18 : vector<1x32xf32> to vector<16x32xf32>
    %120 = arith.addf %118, %119 : vector<16x32xf32>
    %cst_47 = arith.constant dense<0.000000e+00> : vector<16xf32>
    %121 = vector.multi_reduction <add>, %120, %cst_47 [1] : vector<16x32xf32> to vector<16xf32>
    %122 = vector.shape_cast %121 : vector<16xf32> to vector<16x1xf32>
    %cst_48 = arith.constant 3.200000e+01 : f32
    %123 = vector.broadcast %cst_48 : f32 to vector<16x1xf32>
    %124 = arith.divf %122, %123 : vector<16x1xf32>
    %125 = vector.broadcast %124 : vector<16x1xf32> to vector<16x32xf32>
    %126 = arith.subf %120, %125 : vector<16x32xf32>
    %127 = arith.mulf %126, %126 : vector<16x32xf32>
    %cst_49 = arith.constant dense<0.000000e+00> : vector<16xf32>
    %128 = vector.multi_reduction <add>, %127, %cst_49 [1] : vector<16x32xf32> to vector<16xf32>
    %129 = vector.shape_cast %128 : vector<16xf32> to vector<16x1xf32>
    %cst_50 = arith.constant 3.200000e+01 : f32
    %130 = vector.broadcast %cst_50 : f32 to vector<16x1xf32>
    %131 = arith.divf %129, %130 : vector<16x1xf32>
    %cst_51 = arith.constant 9.99999974E-6 : f32
    %132 = vector.broadcast %cst_51 : f32 to vector<16x1xf32>
    %133 = arith.addf %131, %132 : vector<16x1xf32>
    %134 = math.rsqrt %133 : vector<16x1xf32>
    %135 = vector.broadcast %134 : vector<16x1xf32> to vector<16x32xf32>
    %136 = arith.mulf %126, %135 : vector<16x32xf32>
    %137 = arith.truncf %136 : vector<16x32xf32> to vector<16x32xbf16>
    %c0_52 = arith.constant 0 : index
    %c0_53 = arith.constant 0 : index
    %c0_54 = arith.constant 0 : index
    %138 = vector.load %arg5[%c0_52, %c0_53, %c0_54] : memref<2x32x128xbf16, #tpu.memory_space<vmem>>, vector<1x32x128xbf16>
    %139 = vector.shape_cast %138 : vector<1x32x128xbf16> to vector<32x128xbf16>
    %cst_55 = arith.constant dense<0.000000e+00> : vector<16x128xf32>
    %140 = tpu.matmul %137, %139, %cst_55 {dimension_numbers = #tpu.dot_dimension_numbers<[1], [0], [0], [1], [0, 0, 1, 1], [], []>} : vector<16x32xbf16>, vector<32x128xbf16>, vector<16x128xf32> -> vector<16x128xf32>
    %141 = vector.broadcast %19 : vector<1x128xf32> to vector<16x128xf32>
    %142 = arith.addf %140, %141 : vector<16x128xf32>
    %cst_56 = arith.constant 0.000000e+00 : f32
    %143 = vector.broadcast %cst_56 : f32 to vector<16x128xf32>
    %144 = arith.maximumf %142, %143 : vector<16x128xf32>
    %145 = arith.truncf %144 : vector<16x128xf32> to vector<16x128xbf16>
    %c0_57 = arith.constant 0 : index
    %c0_58 = arith.constant 0 : index
    %c0_59 = arith.constant 0 : index
    %146 = vector.load %arg6[%c0_57, %c0_58, %c0_59] : memref<2x128x32xbf16, #tpu.memory_space<vmem>>, vector<1x128x32xbf16>
    %147 = vector.shape_cast %146 : vector<1x128x32xbf16> to vector<128x32xbf16>
    %cst_60 = arith.constant dense<0.000000e+00> : vector<16x32xf32>
    %148 = tpu.matmul %145, %147, %cst_60 {dimension_numbers = #tpu.dot_dimension_numbers<[1], [0], [0], [1], [0, 0, 1, 1], [], []>} : vector<16x128xbf16>, vector<128x32xbf16>, vector<16x32xf32> -> vector<16x32xf32>
    %149 = arith.addf %120, %148 : vector<16x32xf32>
    %150 = vector.broadcast %20 : vector<1x32xf32> to vector<16x32xf32>
    %151 = arith.addf %149, %150 : vector<16x32xf32>
    %c1_61 = arith.constant 1 : index
    %c0_62 = arith.constant 0 : index
    %c0_63 = arith.constant 0 : index
    %152 = vector.load %arg7[%c1_61, %c0_62, %c0_63] : memref<2x4x128xf32, #tpu.memory_space<vmem>>, vector<1x4x128xf32>
    %153 = vector.shape_cast %152 : vector<1x4x128xf32> to vector<4x128xf32>
    %154 = vector.extract_strided_slice %153 {offsets = [0, 0], sizes = [1, 96], strides = [1, 1]} : vector<4x128xf32> to vector<1x96xf32>
    %155 = vector.extract_strided_slice %153 {offsets = [1, 0], sizes = [1, 32], strides = [1, 1]} : vector<4x128xf32> to vector<1x32xf32>
    %156 = vector.extract_strided_slice %153 {offsets = [2, 0], sizes = [1, 128], strides = [1, 1]} : vector<4x128xf32> to vector<1x128xf32>
    %157 = vector.extract_strided_slice %153 {offsets = [3, 0], sizes = [1, 32], strides = [1, 1]} : vector<4x128xf32> to vector<1x32xf32>
    %cst_64 = arith.constant dense<0.000000e+00> : vector<16xf32>
    %158 = vector.multi_reduction <add>, %151, %cst_64 [1] : vector<16x32xf32> to vector<16xf32>
    %159 = vector.shape_cast %158 : vector<16xf32> to vector<16x1xf32>
    %cst_65 = arith.constant 3.200000e+01 : f32
    %160 = vector.broadcast %cst_65 : f32 to vector<16x1xf32>
    %161 = arith.divf %159, %160 : vector<16x1xf32>
    %162 = vector.broadcast %161 : vector<16x1xf32> to vector<16x32xf32>
    %163 = arith.subf %151, %162 : vector<16x32xf32>
    %164 = arith.mulf %163, %163 : vector<16x32xf32>
    %cst_66 = arith.constant dense<0.000000e+00> : vector<16xf32>
    %165 = vector.multi_reduction <add>, %164, %cst_66 [1] : vector<16x32xf32> to vector<16xf32>
    %166 = vector.shape_cast %165 : vector<16xf32> to vector<16x1xf32>
    %cst_67 = arith.constant 3.200000e+01 : f32
    %167 = vector.broadcast %cst_67 : f32 to vector<16x1xf32>
    %168 = arith.divf %166, %167 : vector<16x1xf32>
    %cst_68 = arith.constant 9.99999974E-6 : f32
    %169 = vector.broadcast %cst_68 : f32 to vector<16x1xf32>
    %170 = arith.addf %168, %169 : vector<16x1xf32>
    %171 = math.rsqrt %170 : vector<16x1xf32>
    %172 = vector.broadcast %171 : vector<16x1xf32> to vector<16x32xf32>
    %173 = arith.mulf %163, %172 : vector<16x32xf32>
    %174 = arith.truncf %173 : vector<16x32xf32> to vector<16x32xbf16>
    %c1_69 = arith.constant 1 : index
    %c0_70 = arith.constant 0 : index
    %c0_71 = arith.constant 0 : index
    %175 = vector.load %arg3[%c1_69, %c0_70, %c0_71] : memref<2x32x96xbf16, #tpu.memory_space<vmem>>, vector<1x32x96xbf16>
    %176 = vector.shape_cast %175 : vector<1x32x96xbf16> to vector<32x96xbf16>
    %cst_72 = arith.constant dense<0.000000e+00> : vector<16x96xf32>
    %177 = tpu.matmul %174, %176, %cst_72 {dimension_numbers = #tpu.dot_dimension_numbers<[1], [0], [0], [1], [0, 0, 1, 1], [], []>} : vector<16x32xbf16>, vector<32x96xbf16>, vector<16x96xf32> -> vector<16x96xf32>
    %178 = vector.broadcast %154 : vector<1x96xf32> to vector<16x96xf32>
    %179 = arith.addf %177, %178 : vector<16x96xf32>
    %180 = vector.extract_strided_slice %179 {offsets = [0, 32], sizes = [16, 32], strides = [1, 1]} : vector<16x96xf32> to vector<16x32xf32>
    %181 = tpu.transpose %180, [1, 0] : vector<16x32xf32> -> vector<32x16xf32>
    %182 = vector.extract_strided_slice %179 {offsets = [0, 0], sizes = [16, 8], strides = [1, 1]} : vector<16x96xf32> to vector<16x8xf32>
    %183 = vector.extract_strided_slice %181 {offsets = [0, 0], sizes = [8, 16], strides = [1, 1]} : vector<32x16xf32> to vector<8x16xf32>
    %cst_73 = arith.constant dense<0.000000e+00> : vector<16x16xf32>
    %184 = tpu.matmul %182, %183, %cst_73 {dimension_numbers = #tpu.dot_dimension_numbers<[1], [0], [0], [1], [0, 0, 1, 1], [], []>} : vector<16x8xf32>, vector<8x16xf32>, vector<16x16xf32> -> vector<16x16xf32>
    %185 = arith.addf %184, %14 : vector<16x16xf32>
    %cst_74 = arith.constant dense<0xFF800000> : vector<16xf32>
    %186 = vector.multi_reduction <maximumf>, %185, %cst_74 [1] : vector<16x16xf32> to vector<16xf32>
    %187 = vector.shape_cast %186 : vector<16xf32> to vector<16x1xf32>
    %188 = vector.broadcast %187 : vector<16x1xf32> to vector<16x16xf32>
    %189 = arith.subf %185, %188 : vector<16x16xf32>
    %190 = math.exp %189 : vector<16x16xf32>
    %cst_75 = arith.constant dense<0.000000e+00> : vector<16xf32>
    %191 = vector.multi_reduction <add>, %190, %cst_75 [1] : vector<16x16xf32> to vector<16xf32>
    %192 = vector.shape_cast %191 : vector<16xf32> to vector<16x1xf32>
    %193 = tpu.reciprocal %192 {approx = true} : vector<16x1xf32> -> vector<16x1xf32>
    %194 = vector.broadcast %193 : vector<16x1xf32> to vector<16x16xf32>
    %195 = arith.mulf %190, %194 : vector<16x16xf32>
    %196 = vector.extract_strided_slice %179 {offsets = [0, 64], sizes = [16, 8], strides = [1, 1]} : vector<16x96xf32> to vector<16x8xf32>
    %cst_76 = arith.constant dense<0.000000e+00> : vector<16x8xf32>
    %197 = tpu.matmul %195, %196, %cst_76 {dimension_numbers = #tpu.dot_dimension_numbers<[1], [0], [0], [1], [0, 0, 1, 1], [], []>} : vector<16x16xf32>, vector<16x8xf32>, vector<16x8xf32> -> vector<16x8xf32>
    %c0_77 = arith.constant 0 : index
    %c0_78 = arith.constant 0 : index
    %198 = vector.load %arg11[%c0_77, %c0_78] : memref<16x32xf32, #tpu.memory_space<vmem>>, vector<16x8xf32>
    tpu.vector_store %arg11[%c0_77, %c0_78], %197 {strides = array<i32>} : memref<16x32xf32, #tpu.memory_space<vmem>>, vector<16x8xf32>,
    %199 = vector.extract_strided_slice %179 {offsets = [0, 8], sizes = [16, 8], strides = [1, 1]} : vector<16x96xf32> to vector<16x8xf32>
    %200 = vector.extract_strided_slice %181 {offsets = [8, 0], sizes = [8, 16], strides = [1, 1]} : vector<32x16xf32> to vector<8x16xf32>
    %cst_79 = arith.constant dense<0.000000e+00> : vector<16x16xf32>
    %201 = tpu.matmul %199, %200, %cst_79 {dimension_numbers = #tpu.dot_dimension_numbers<[1], [0], [0], [1], [0, 0, 1, 1], [], []>} : vector<16x8xf32>, vector<8x16xf32>, vector<16x16xf32> -> vector<16x16xf32>
    %202 = arith.addf %201, %14 : vector<16x16xf32>
    %cst_80 = arith.constant dense<0xFF800000> : vector<16xf32>
    %203 = vector.multi_reduction <maximumf>, %202, %cst_80 [1] : vector<16x16xf32> to vector<16xf32>
    %204 = vector.shape_cast %203 : vector<16xf32> to vector<16x1xf32>
    %205 = vector.broadcast %204 : vector<16x1xf32> to vector<16x16xf32>
    %206 = arith.subf %202, %205 : vector<16x16xf32>
    %207 = math.exp %206 : vector<16x16xf32>
    %cst_81 = arith.constant dense<0.000000e+00> : vector<16xf32>
    %208 = vector.multi_reduction <add>, %207, %cst_81 [1] : vector<16x16xf32> to vector<16xf32>
    %209 = vector.shape_cast %208 : vector<16xf32> to vector<16x1xf32>
    %210 = tpu.reciprocal %209 {approx = true} : vector<16x1xf32> -> vector<16x1xf32>
    %211 = vector.broadcast %210 : vector<16x1xf32> to vector<16x16xf32>
    %212 = arith.mulf %207, %211 : vector<16x16xf32>
    %213 = vector.extract_strided_slice %179 {offsets = [0, 72], sizes = [16, 8], strides = [1, 1]} : vector<16x96xf32> to vector<16x8xf32>
    %cst_82 = arith.constant dense<0.000000e+00> : vector<16x8xf32>
    %214 = tpu.matmul %212, %213, %cst_82 {dimension_numbers = #tpu.dot_dimension_numbers<[1], [0], [0], [1], [0, 0, 1, 1], [], []>} : vector<16x16xf32>, vector<16x8xf32>, vector<16x8xf32> -> vector<16x8xf32>
    %c0_83 = arith.constant 0 : index
    %c8_84 = arith.constant 8 : index
    %215 = vector.load %arg11[%c0_83, %c8_84] : memref<16x32xf32, #tpu.memory_space<vmem>>, vector<16x8xf32>
    tpu.vector_store %arg11[%c0_83, %c8_84], %214 {strides = array<i32>} : memref<16x32xf32, #tpu.memory_space<vmem>>, vector<16x8xf32>,
    %216 = vector.extract_strided_slice %179 {offsets = [0, 16], sizes = [16, 8], strides = [1, 1]} : vector<16x96xf32> to vector<16x8xf32>
    %217 = vector.extract_strided_slice %181 {offsets = [16, 0], sizes = [8, 16], strides = [1, 1]} : vector<32x16xf32> to vector<8x16xf32>
    %cst_85 = arith.constant dense<0.000000e+00> : vector<16x16xf32>
    %218 = tpu.matmul %216, %217, %cst_85 {dimension_numbers = #tpu.dot_dimension_numbers<[1], [0], [0], [1], [0, 0, 1, 1], [], []>} : vector<16x8xf32>, vector<8x16xf32>, vector<16x16xf32> -> vector<16x16xf32>
    %219 = arith.addf %218, %14 : vector<16x16xf32>
    %cst_86 = arith.constant dense<0xFF800000> : vector<16xf32>
    %220 = vector.multi_reduction <maximumf>, %219, %cst_86 [1] : vector<16x16xf32> to vector<16xf32>
    %221 = vector.shape_cast %220 : vector<16xf32> to vector<16x1xf32>
    %222 = vector.broadcast %221 : vector<16x1xf32> to vector<16x16xf32>
    %223 = arith.subf %219, %222 : vector<16x16xf32>
    %224 = math.exp %223 : vector<16x16xf32>
    %cst_87 = arith.constant dense<0.000000e+00> : vector<16xf32>
    %225 = vector.multi_reduction <add>, %224, %cst_87 [1] : vector<16x16xf32> to vector<16xf32>
    %226 = vector.shape_cast %225 : vector<16xf32> to vector<16x1xf32>
    %227 = tpu.reciprocal %226 {approx = true} : vector<16x1xf32> -> vector<16x1xf32>
    %228 = vector.broadcast %227 : vector<16x1xf32> to vector<16x16xf32>
    %229 = arith.mulf %224, %228 : vector<16x16xf32>
    %230 = vector.extract_strided_slice %179 {offsets = [0, 80], sizes = [16, 8], strides = [1, 1]} : vector<16x96xf32> to vector<16x8xf32>
    %cst_88 = arith.constant dense<0.000000e+00> : vector<16x8xf32>
    %231 = tpu.matmul %229, %230, %cst_88 {dimension_numbers = #tpu.dot_dimension_numbers<[1], [0], [0], [1], [0, 0, 1, 1], [], []>} : vector<16x16xf32>, vector<16x8xf32>, vector<16x8xf32> -> vector<16x8xf32>
    %c0_89 = arith.constant 0 : index
    %c16_90 = arith.constant 16 : index
    %232 = vector.load %arg11[%c0_89, %c16_90] : memref<16x32xf32, #tpu.memory_space<vmem>>, vector<16x8xf32>
    tpu.vector_store %arg11[%c0_89, %c16_90], %231 {strides = array<i32>} : memref<16x32xf32, #tpu.memory_space<vmem>>, vector<16x8xf32>,
    %233 = vector.extract_strided_slice %179 {offsets = [0, 24], sizes = [16, 8], strides = [1, 1]} : vector<16x96xf32> to vector<16x8xf32>
    %234 = vector.extract_strided_slice %181 {offsets = [24, 0], sizes = [8, 16], strides = [1, 1]} : vector<32x16xf32> to vector<8x16xf32>
    %cst_91 = arith.constant dense<0.000000e+00> : vector<16x16xf32>
    %235 = tpu.matmul %233, %234, %cst_91 {dimension_numbers = #tpu.dot_dimension_numbers<[1], [0], [0], [1], [0, 0, 1, 1], [], []>} : vector<16x8xf32>, vector<8x16xf32>, vector<16x16xf32> -> vector<16x16xf32>
    %236 = arith.addf %235, %14 : vector<16x16xf32>
    %cst_92 = arith.constant dense<0xFF800000> : vector<16xf32>
    %237 = vector.multi_reduction <maximumf>, %236, %cst_92 [1] : vector<16x16xf32> to vector<16xf32>
    %238 = vector.shape_cast %237 : vector<16xf32> to vector<16x1xf32>
    %239 = vector.broadcast %238 : vector<16x1xf32> to vector<16x16xf32>
    %240 = arith.subf %236, %239 : vector<16x16xf32>
    %241 = math.exp %240 : vector<16x16xf32>
    %cst_93 = arith.constant dense<0.000000e+00> : vector<16xf32>
    %242 = vector.multi_reduction <add>, %241, %cst_93 [1] : vector<16x16xf32> to vector<16xf32>
    %243 = vector.shape_cast %242 : vector<16xf32> to vector<16x1xf32>
    %244 = tpu.reciprocal %243 {approx = true} : vector<16x1xf32> -> vector<16x1xf32>
    %245 = vector.broadcast %244 : vector<16x1xf32> to vector<16x16xf32>
    %246 = arith.mulf %241, %245 : vector<16x16xf32>
    %247 = vector.extract_strided_slice %179 {offsets = [0, 88], sizes = [16, 8], strides = [1, 1]} : vector<16x96xf32> to vector<16x8xf32>
    %cst_94 = arith.constant dense<0.000000e+00> : vector<16x8xf32>
    %248 = tpu.matmul %246, %247, %cst_94 {dimension_numbers = #tpu.dot_dimension_numbers<[1], [0], [0], [1], [0, 0, 1, 1], [], []>} : vector<16x16xf32>, vector<16x8xf32>, vector<16x8xf32> -> vector<16x8xf32>
    %c0_95 = arith.constant 0 : index
    %c24_96 = arith.constant 24 : index
    %249 = vector.load %arg11[%c0_95, %c24_96] : memref<16x32xf32, #tpu.memory_space<vmem>>, vector<16x8xf32>
    tpu.vector_store %arg11[%c0_95, %c24_96], %248 {strides = array<i32>} : memref<16x32xf32, #tpu.memory_space<vmem>>, vector<16x8xf32>,
    %c0_97 = arith.constant 0 : index
    %c0_98 = arith.constant 0 : index
    %250 = vector.load %arg11[%c0_97, %c0_98] : memref<16x32xf32, #tpu.memory_space<vmem>>, vector<16x32xf32>
    %251 = arith.truncf %250 : vector<16x32xf32> to vector<16x32xbf16>
    %c1_99 = arith.constant 1 : index
    %c0_100 = arith.constant 0 : index
    %c0_101 = arith.constant 0 : index
    %252 = vector.load %arg4[%c1_99, %c0_100, %c0_101] : memref<2x32x32xbf16, #tpu.memory_space<vmem>>, vector<1x32x32xbf16>
    %253 = vector.shape_cast %252 : vector<1x32x32xbf16> to vector<32x32xbf16>
    %cst_102 = arith.constant dense<0.000000e+00> : vector<16x32xf32>
    %254 = tpu.matmul %251, %253, %cst_102 {dimension_numbers = #tpu.dot_dimension_numbers<[1], [0], [0], [1], [0, 0, 1, 1], [], []>} : vector<16x32xbf16>, vector<32x32xbf16>, vector<16x32xf32> -> vector<16x32xf32>
    %255 = arith.addf %151, %254 : vector<16x32xf32>
    %256 = vector.broadcast %155 : vector<1x32xf32> to vector<16x32xf32>
    %257 = arith.addf %255, %256 : vector<16x32xf32>
    %cst_103 = arith.constant dense<0.000000e+00> : vector<16xf32>
    %258 = vector.multi_reduction <add>, %257, %cst_103 [1] : vector<16x32xf32> to vector<16xf32>
    %259 = vector.shape_cast %258 : vector<16xf32> to vector<16x1xf32>
    %cst_104 = arith.constant 3.200000e+01 : f32
    %260 = vector.broadcast %cst_104 : f32 to vector<16x1xf32>
    %261 = arith.divf %259, %260 : vector<16x1xf32>
    %262 = vector.broadcast %261 : vector<16x1xf32> to vector<16x32xf32>
    %263 = arith.subf %257, %262 : vector<16x32xf32>
    %264 = arith.mulf %263, %263 : vector<16x32xf32>
    %cst_105 = arith.constant dense<0.000000e+00> : vector<16xf32>
    %265 = vector.multi_reduction <add>, %264, %cst_105 [1] : vector<16x32xf32> to vector<16xf32>
    %266 = vector.shape_cast %265 : vector<16xf32> to vector<16x1xf32>
    %cst_106 = arith.constant 3.200000e+01 : f32
    %267 = vector.broadcast %cst_106 : f32 to vector<16x1xf32>
    %268 = arith.divf %266, %267 : vector<16x1xf32>
    %cst_107 = arith.constant 9.99999974E-6 : f32
    %269 = vector.broadcast %cst_107 : f32 to vector<16x1xf32>
    %270 = arith.addf %268, %269 : vector<16x1xf32>
    %271 = math.rsqrt %270 : vector<16x1xf32>
    %272 = vector.broadcast %271 : vector<16x1xf32> to vector<16x32xf32>
    %273 = arith.mulf %263, %272 : vector<16x32xf32>
    %274 = arith.truncf %273 : vector<16x32xf32> to vector<16x32xbf16>
    %c1_108 = arith.constant 1 : index
    %c0_109 = arith.constant 0 : index
    %c0_110 = arith.constant 0 : index
    %275 = vector.load %arg5[%c1_108, %c0_109, %c0_110] : memref<2x32x128xbf16, #tpu.memory_space<vmem>>, vector<1x32x128xbf16>
    %276 = vector.shape_cast %275 : vector<1x32x128xbf16> to vector<32x128xbf16>
    %cst_111 = arith.constant dense<0.000000e+00> : vector<16x128xf32>
    %277 = tpu.matmul %274, %276, %cst_111 {dimension_numbers = #tpu.dot_dimension_numbers<[1], [0], [0], [1], [0, 0, 1, 1], [], []>} : vector<16x32xbf16>, vector<32x128xbf16>, vector<16x128xf32> -> vector<16x128xf32>
    %278 = vector.broadcast %156 : vector<1x128xf32> to vector<16x128xf32>
    %279 = arith.addf %277, %278 : vector<16x128xf32>
    %cst_112 = arith.constant 0.000000e+00 : f32
    %280 = vector.broadcast %cst_112 : f32 to vector<16x128xf32>
    %281 = arith.maximumf %279, %280 : vector<16x128xf32>
    %282 = arith.truncf %281 : vector<16x128xf32> to vector<16x128xbf16>
    %c1_113 = arith.constant 1 : index
    %c0_114 = arith.constant 0 : index
    %c0_115 = arith.constant 0 : index
    %283 = vector.load %arg6[%c1_113, %c0_114, %c0_115] : memref<2x128x32xbf16, #tpu.memory_space<vmem>>, vector<1x128x32xbf16>
    %284 = vector.shape_cast %283 : vector<1x128x32xbf16> to vector<128x32xbf16>
    %cst_116 = arith.constant dense<0.000000e+00> : vector<16x32xf32>
    %285 = tpu.matmul %282, %284, %cst_116 {dimension_numbers = #tpu.dot_dimension_numbers<[1], [0], [0], [1], [0, 0, 1, 1], [], []>} : vector<16x128xbf16>, vector<128x32xbf16>, vector<16x32xf32> -> vector<16x32xf32>
    %286 = arith.addf %257, %285 : vector<16x32xf32>
    %287 = vector.broadcast %157 : vector<1x32xf32> to vector<16x32xf32>
    %288 = arith.addf %286, %287 : vector<16x32xf32>
    %cst_117 = arith.constant dense<0.000000e+00> : vector<16xf32>
    %289 = vector.multi_reduction <add>, %288, %cst_117 [1] : vector<16x32xf32> to vector<16xf32>
    %290 = vector.shape_cast %289 : vector<16xf32> to vector<16x1xf32>
    %cst_118 = arith.constant 3.200000e+01 : f32
    %291 = vector.broadcast %cst_118 : f32 to vector<16x1xf32>
    %292 = arith.divf %290, %291 : vector<16x1xf32>
    %293 = vector.broadcast %292 : vector<16x1xf32> to vector<16x32xf32>
    %294 = arith.subf %288, %293 : vector<16x32xf32>
    %295 = arith.mulf %294, %294 : vector<16x32xf32>
    %cst_119 = arith.constant dense<0.000000e+00> : vector<16xf32>
    %296 = vector.multi_reduction <add>, %295, %cst_119 [1] : vector<16x32xf32> to vector<16xf32>
    %297 = vector.shape_cast %296 : vector<16xf32> to vector<16x1xf32>
    %cst_120 = arith.constant 3.200000e+01 : f32
    %298 = vector.broadcast %cst_120 : f32 to vector<16x1xf32>
    %299 = arith.divf %297, %298 : vector<16x1xf32>
    %cst_121 = arith.constant 9.99999974E-6 : f32
    %300 = vector.broadcast %cst_121 : f32 to vector<16x1xf32>
    %301 = arith.addf %299, %300 : vector<16x1xf32>
    %302 = math.rsqrt %301 : vector<16x1xf32>
    %303 = vector.broadcast %302 : vector<16x1xf32> to vector<16x32xf32>
    %304 = arith.mulf %294, %303 : vector<16x32xf32>
    %305 = arith.truncf %304 : vector<16x32xf32> to vector<16x32xbf16>
    %c0_122 = arith.constant 0 : index
    %c0_123 = arith.constant 0 : index
    %306 = vector.load %arg8[%c0_122, %c0_123] : memref<32x128xbf16, #tpu.memory_space<vmem>>, vector<32x128xbf16>
    %cst_124 = arith.constant dense<0.000000e+00> : vector<16x128xf32>
    %307 = tpu.matmul %305, %306, %cst_124 {dimension_numbers = #tpu.dot_dimension_numbers<[1], [0], [0], [1], [0, 0, 1, 1], [], []>} : vector<16x32xbf16>, vector<32x128xbf16>, vector<16x128xf32> -> vector<16x128xf32>
    %c0_125 = arith.constant 0 : index
    %c0_126 = arith.constant 0 : index
    %308 = vector.load %arg9[%c0_125, %c0_126] : memref<1x128xf32, #tpu.memory_space<vmem>>, vector<1x128xf32>
    %309 = vector.broadcast %308 : vector<1x128xf32> to vector<16x128xf32>
    %310 = arith.addf %307, %309 : vector<16x128xf32>
    %c0_127 = arith.constant 0 : index
    %c0_128 = arith.constant 0 : index
    %311 = vector.load %arg10[%c0_127, %c0_128] : memref<16x128xf32, #tpu.memory_space<vmem>>, vector<16x128xf32>
    tpu.vector_store %arg10[%c0_127, %c0_128], %310 {strides = array<i32>} : memref<16x128xf32, #tpu.memory_space<vmem>>, vector<16x128xf32>,
    return
  }
}

</mosaic_0001>

<bundles_post_ra>
// kernel: tpu_custom_call.1
= control target key start
LH: loop header
LB: loop body
LE: loop exit
PB: predicated region body
PF: predicated region fallthrough
CT: control target
= control target key end

     0   :  { %v3453_v2 = vmov 1   ;;  %v3454_v3 = vmov 0   ;;  %v3455_v5 = vmov 0.0   ;;  %vm102_vm0 = vcmask 1043456   ;;  %s4061_s0 = inlined_call_operand.vmem [shape: s32[16,2], index: 0, kind: input, shape index: {}]   ;;  %s4062_s1 = inlined_call_operand.vmem [shape: bf16[72,32], index: 1, kind: input, shape index: {}]   ;;  %s4063_s2 = inlined_call_operand.vmem [shape: f32[16,16], index: 2, kind: input, shape index: {}]   ;;  %s4064_s3 = inlined_call_operand.vmem [shape: bf16[2,32,96], index: 3, kind: input, shape index: {}]   ;;  %s4065_s4 = inlined_call_operand.vmem [shape: bf16[2,32,32], index: 4, kind: input, shape index: {}]   ;;  %s4066_s5 = inlined_call_operand.vmem [shape: bf16[2,32,128], index: 5, kind: input, shape index: {}]   ;;  %s4067_s6 = inlined_call_operand.vmem [shape: bf16[2,128,32], index: 6, kind: input, shape index: {}]   ;;  %s4068_s7 = inlined_call_operand.vmem [shape: f32[2,4,128], index: 7, kind: input, shape index: {}]   ;;  %s4069_s8 = inlined_call_operand.vmem [shape: bf16[32,128], index: 8, kind: input, shape index: {}]   ;;  %s4070_s9 = inlined_call_operand.vmem [shape: f32[1,128], index: 9, kind: input, shape index: {}]   ;;  %s4071_s10 = inlined_call_operand.hbm [shape: f32[16,128], index: 10, kind: output, shape index: {}]  }
   0x1   :  { %v37_v0 = vld [vmem:[%s4061_s0] sm:$0xff]  ;;  %3226 = vset.pattern.permute.xlu1 %v3453_v2  ;;  %3225 = vset.pattern.permute.xlu0 %v3454_v3  ;;  %v38_v4 = vld [vmem:[%s4061_s0 + $0x8] sm:$0xff]  ;;  %v3310_v8 = vld [vmem:[%s4062_s1 + $0x10] sm:$0xff]   ;;  %vm3456_vm1 = vmmov 0  }
   0x2   :  { %v3308_v1 = vld [vmem:[%s4062_s1] sm:$0xff]   ;;  %50 = vperm.xlu1 %3226, %v37_v0   ;;  %42 = vperm.xlu0 %3225, %v37_v0   ;;  %v3309_v6 = vld [vmem:[%s4062_s1 + $0x8] sm:$0xff]   ;;  %v3311_v10 = vld [vmem:[%s4062_s1 + $0x18] sm:$0xff]  }
   0x3   :  { %2903 = vmatprep.subr.bf16.mxu0 %v3455_v5  ;;  %v3312_v7 = vld [vmem:[%s4062_s1 + $0x20] ss:$0 sps:$4 sm:$0xff]   ;;  %2913 = vmatprep.mubr.msk.bf16.mxu0 %vm3456_vm1, %v3455_v5 }
   0x4   :  { %2904 = vmatpush3.bf16.msra.mxu0 %v3308_v1  ;;  %v104_v9 = vsel %vm102_vm0, %v3312_v7, 0 }
   0x5   :  { %2905 = vmatprep.subr.bf16.mxu0 %v3455_v5 }
   0x6   :  { %53 = vperm.xlu1 %3226, %v38_v4   ;;  %45 = vperm.xlu0 %3225, %v38_v4  }
   0x8   :  { %2906 = vmatpush3.bf16.msra.mxu0 %v3309_v6 }
   0x9   :  { %2907 = vmatprep.subr.bf16.mxu0 %v3455_v5 }
   0xa   :  { %3307 = vset.pattern.permute.xlu0 %v3453_v2 }
   0xc   :  { %2908 = vmatpush3.bf16.msra.mxu0 %v3310_v8 }
   0xd   :  { %2909 = vmatprep.subr.bf16.mxu0 %v3455_v5 }
  0x10   :  { %2910 = vmatpush3.bf16.msra.mxu0 %v3311_v10 }
  0x11   :  { %2911 = vmatprep.subr.bf16.mxu0 %v3455_v5 }
  0x14   :  { %2912 = vmatpush3.bf16.msra.mxu0 %v104_v9 }
  0x15   :  { %2917 = vmatprep.subr.bf16.mxu0 %v3455_v5 }
  0x16   :  { %15 = vsyncpa [#allocation4], 0  ;;  %v39_v11 = vlaneseq  ;;  %vm98_vm8 = vcmask 588800   ;;  %vm150_vm9 = vcmask 261120   ;;  %v3313_v36 = vld [vmem:[%s4064_s3] sm:$0xff]   ;;  %v3314_v37 = vld [vmem:[%s4064_s3 + $0x8] sm:$0xff]  }
  0x17   :  { %v3587_v51 = vld [vmem:[%s4068_s7] sm:$0xf]  ;;  %vm249_vm10 = vcmask 64512   ;;  %s3457_s11 = smov 88   ;;  %s3458_s12 = smov 96   ;;  %v3631_v8 = vld [vmem:[%s4063_s2 + $0x8] sm:$0xff] }
  0x18   :  { %v40_v12 = vand.u32 127, %v39_v11  ;;  %v3581_v49 = vshrl.u32 %v39_v11, 7  ;;  %s3459_s13 = smov 120   ;;  %vm3612_vm11 = vmpackc.low %vm249_vm10, %vm249_vm10  ;;  %v3636_v9 = vld [vmem:[%s4063_s2] sm:$0xff]  ;;  %vm333_vm12 = vcmask 130048   ;;  %s3460_s18 = smov 64  }
  0x19   :  { %s3461_s19 = smov 80   ;;  %s3462_s20 = smov 56   ;;  %vm653_vm13 = vcmask 130112   ;;  %vm864_vm14 = vcmask 195712   ;;  %vm1075_vm15 = vcmask 261312  }
  0x1a   :  { %v185_v50 = vsub.s32 0, %v3581_v49  ;;  %s3463_s21 = smov 112   ;;  %s3464_s22 = smov 72  }
  0x1b   :  { %s3465_s23 = smov 104   ;;  %s3466_s24 = smov 48  }
  0x1c   :  { %v186_v52 = vrot.slane %v3587_v51, %v185_v50  ;;  %s3467_s0 = smov 8   ;;  %s3468_s25 = smov 40  }
  0x1d   :  { %s3469_s1 = smov 16   ;;  %s3470_s30 = smov 24  }
  0x81   :  { %v51_v13 = vpop.permute.xlu1 %50  ;;  %v43_v14 = vpop.permute.xlu0 %42 }
  0x82   :  { %vm55_vm2 = vcmp.eq.s32.totalorder %v40_v12, %v51_v13  ;;  %vm47_vm3 = vcmp.eq.s32.totalorder %v40_v12, %v43_v14 }
  0x83   :  { %vm57_vm4 = vmor %vm47_vm3, %vm55_vm2 }
  0x84   :  { %v59_v17 = vsel %vm57_vm4, 1.0, %v3455_v5 }
  0x85   :  { %v54_v15 = vpop.permute.xlu1 %53  ;;  %v46_v16 = vpop.permute.xlu0 %45 }
  0x86   :  { %vm56_vm5 = vcmp.eq.s32.totalorder %v40_v12, %v54_v15  ;;  %vm48_vm6 = vcmp.eq.s32.totalorder %v40_v12, %v46_v16 }
  0x87   :  { %vm58_vm7 = vmor %vm48_vm6, %vm56_vm5 }
  0x88   :  { %v60_v18 = vsel %vm58_vm7, 1.0, %v3455_v5 }
  0x89   :  { %v61_v19 = vpack.c.bf16 %v60_v18, %v59_v17 }
  0x8b   :  { %2914 = vmatmul.mubr.msk.bf16.vlgmr.msra.gmra.mrb[0].mxu0 %vm98_vm8, %v61_v19 }
  0x8c   :  { %2921 = vmatprep.mubr.msk.bf16.mxu0 %vm3456_vm1, %v3455_v5  ;;  %2918 = vmatpush3.bf16.msra.mxu0 %v3313_v36 }
  0x8d   :  { %2919 = vmatprep.subr.bf16.mxu0 %v3455_v5 }
  0x90   :  { %2920 = vmatpush3.bf16.msra.mxu0 %v3314_v37 }
 0x15e   :  { %v3561_v20 = vpop.f32.mrb[0].mxu0 }
 0x15f   :  { %v2915_v21 = vpop.f32.mrb[1].mxu0  ;;  %v151_v22 = vsel %vm150_vm9, %v3561_v20, 0.0 }
 0x160   :  { %152 = vadd.xlane.f32.xlu0 %v151_v22  ;;  %v3565_v23 = vpop.f32.mrb[2].mxu0 }
 0x161   :  { %v2916_v24 = vpop.f32.mrb[3].mxu0  ;;  %v154_v25 = vsel %vm150_vm9, %v3565_v23, 0.0 }
 0x162   :  { %155 = vadd.xlane.f32.xlu1 %v154_v25 }
 0x1ed   :  { %v153_v26 = vpop.xlane.xlu0 %152 }
 0x1ee   :  { %v158_v27 = vmul.f32 0.03125, %v153_v26 }
 0x1ef   :  { %v156_v28 = vpop.xlane.xlu1 %155 }
 0x1f0   :  { %v160_v29 = vsub.f32 %v3561_v20, %v158_v27  ;;  %v159_v30 = vmul.f32 0.03125, %v156_v28 }
 0x1f2   :  { %v161_v31 = vsub.f32 %v3565_v23, %v159_v30  ;;  %v162_v32 = vmul.f32 %v160_v29, %v160_v29 }
 0x1f4   :  { %v164_v33 = vsel %vm150_vm9, %v162_v32, 0.0  ;;  %v163_v34 = vmul.f32 %v161_v31, %v161_v31 }
 0x1f5   :  { %165 = vadd.xlane.f32.xlu0 %v164_v33 }
 0x1f6   :  { %v167_v35 = vsel %vm150_vm9, %v163_v34, 0.0 }
 0x1f9   :  { %168 = vadd.xlane.f32.xlu0 %v167_v35 }
 0x282   :  { %v166_v38 = vpop.xlane.xlu0 %165 }
 0x283   :  { %v170_v39 = vmul.f32 0.03125, %v166_v38 }
 0x285   :  { %v172_v40 = vadd.f32 1e-05, %v170_v39 }
 0x286   :  { %v169_v41 = vpop.xlane.xlu0 %168 }
 0x287   :  { %v171_v42 = vmul.f32 0.03125, %v169_v41  ;;  %3343 = vrsqrt.f32 %v172_v40 }
 0x289   :  { %v173_v43 = vadd.f32 1e-05, %v171_v42 }
 0x28b   :  { %3345 = vrsqrt.f32 %v173_v43 }
 0x291   :  { %v3344_v44 = vpop.eup %3343 }
 0x292   :  { %v176_v46 = vmul.f32 %v3344_v44, %v160_v29 }
 0x295   :  { %v3346_v45 = vpop.eup %3345 }
 0x296   :  { %v177_v47 = vmul.f32 %v3346_v45, %v161_v31 }
 0x298   :  { %v178_v48 = vpack.c.bf16 %v177_v47, %v176_v46 }
 0x29a   :  { %2922 = vmatmul.mubr.msk.bf16.vlgmr.msra.gmra.mrb[4].mxu0 %vm150_vm9, %v178_v48 }
 0x36d   :  { %v236_v53 = vpop.f32.mrb[4].mxu0 }
 0x36e   :  { %v3592_v54 = vadd.f32 %v236_v53, %v186_v52  ;;  %v2923_v55 = vpop.f32.mrb[5].mxu0 }
 0x36f   :  { %v239_v56 = vpop.f32.mrb[6].mxu0 }
 0x370   :  { %v3594_v57 = vadd.f32 %v239_v56, %v186_v52  ;;  %v2924_v58 = vpop.f32.mrb[7].mxu0  ;;  %2929 = vmatprep.mubr.msk.f32.mxu1 %vm249_vm10, %v3592_v54 }
 0x372   :  { %v3600_v59 = vpack.i.bf16 %v3594_v57, %v3592_v54 }
 0x374   :  { %3233 = vrot.lane.b32.xlu0 %v3600_v59, %s3457_s11  ;;  %3228 = vrot.lane.b32.xlu1 %v3600_v59, %s3458_s12 }
 0x378   :  { %445 = vrot.lane.b32.xlu1 %v3592_v54, %s3459_s13 }
 0x37c   :  { %447 = vrot.lane.b32.xlu1 %v3594_v57, %s3459_s13 }
 0x3e6   :  { %v3234_v60 = vpop.permute.xlu0 %3233  ;;  %v3229_v61 = vpop.permute.xlu1 %3228 }
 0x3e7   :  { %v3236_v62 = vunpack.i.h.bf16 %v3234_v60  ;;  %v3235_v63 = vunpack.i.l.bf16 %v3234_v60  ;;  %v3231_v0 = vunpack.i.h.bf16 %v3229_v61  ;;  %v3230_v1 = vunpack.i.l.bf16 %v3229_v61 }
 0x3e9   :  { %v3135_v3 = vpack.c.bf16 %v3236_v62, %v3235_v63  ;;  %v3125_v4 = vpack.c.bf16 %v3231_v0, %v3230_v1 }
 0x3ea   :  { %v446_v6 = vpop.permute.xlu1 %445 }
 0x3eb   :  { %3127 = vmatprep.subr.msk.bf16.mxu1 %vm3612_vm11, %v3125_v4  ;;  %3137 = vmatprep.subr.msk.bf16.mxu0 %vm3612_vm11, %v3135_v3 }
 0x3ec   :  { %2943 = vmatprep.mubr.msk.f32.mxu0 %vm249_vm10, %v446_v6  ;;  %3130 = vmatpush3.bf16.xpose.msk.msra.mxu1 %vm3612_vm11, %v3125_v4 }
 0x3ed   :  { %3140 = vmatpush3.bf16.xpose.msk.msra.mxu0 %vm3612_vm11, %v3135_v3 }
 0x3ee   :  { %v448_v7 = vpop.permute.xlu1 %447 }
 0x3f3   :  { %2930 = vmatmul.mubr.msk.f32.vlgmr.msra.gmra.mrb[0].mxu1 %vm249_vm10, %v3594_v57 }
 0x3f4   :  { %2944 = vmatmul.mubr.msk.f32.vlgmr.msra.gmra.mrb[8].mxu0 %vm249_vm10, %v448_v7 }
 0x4c6   :  { %v2931_v10 = vpop.f32.mrb[0].mxu1 }
 0x4c7   :  { %v330_v11 = vadd.f32 %v2931_v10, %v3631_v8  ;;  %v2945_v12 = vpop.f32.mrb[8].mxu0  ;;  %v324_v13 = vpop.f32.mrb[1].mxu1 }
 0x4c8   :  { %v325_v14 = vadd.f32 %v324_v13, %v3636_v9  ;;  %v527_v15 = vpop.f32.mrb[9].mxu0  ;;  %v533_v19 = vadd.f32 %v2945_v12, %v3631_v8 }
 0x4c9   :  { %v337_v16 = vsel %vm333_vm12, %v330_v11, -inf  ;;  %v528_v17 = vadd.f32 %v527_v15, %v3636_v9 }
 0x4ca   :  { %338 = vmax.xlane.f32.xlu1 %v337_v16  ;;  %v334_v18 = vsel %vm333_vm12, %v325_v14, -inf  ;;  %v539_v22 = vsel %vm333_vm12, %v533_v19, -inf }
 0x4cb   :  { %335 = vmax.xlane.f32.xlu0 %v334_v18  ;;  %v536_v21 = vsel %vm333_vm12, %v528_v17, -inf }
 0x4cf   :  { %537 = vmax.xlane.f32.xlu0 %v536_v21 }
 0x4d3   :  { %540 = vmax.xlane.f32.xlu0 %v539_v22 }
 0x4db   :  { %3238 = vrot.lane.b32.xlu1 %v3600_v59, %s3460_s18 }
 0x557   :  { %v339_v24 = vpop.xlane.xlu1 %338 }
 0x558   :  { %v341_v25 = vsub.f32 %v330_v11, %v339_v24  ;;  %v336_v26 = vpop.xlane.xlu0 %335 }
 0x559   :  { %v340_v27 = vsub.f32 %v325_v14, %v336_v26 }
 0x55a   :  { %v344_v28 = vmul.f32 1.442695, %v341_v25 }
 0x55b   :  { %v342_v29 = vmul.f32 1.442695, %v340_v27  ;;  %v3239_v30 = vpop.permute.xlu1 %3238 }
 0x55c   :  { %3347 = vpow2.f32 %v344_v28  ;;  %v3241_v31 = vunpack.i.h.bf16 %v3239_v30  ;;  %v3240_v32 = vunpack.i.l.bf16 %v3239_v30  ;;  %v538_v33 = vpop.xlane.xlu0 %537 }
 0x55d   :  { %3349 = vpow2.f32 %v342_v29  ;;  %v542_v44 = vsub.f32 %v528_v17, %v538_v33 }
 0x55e   :  { %v3131_v34 = vpack.c.bf16 %v3241_v31, %v3240_v32 }
 0x55f   :  { %v544_v45 = vmul.f32 1.442695, %v542_v44 }
 0x560   :  { %3132 = vmatprep.subr.bf16.mxu1 %v3131_v34  ;;  %v541_v35 = vpop.xlane.xlu0 %540 }
 0x561   :  { %v543_v36 = vsub.f32 %v533_v19, %v541_v35  ;;  %3134 = vmatpush3.bf16.msra.mxu1 %v3131_v34 }
 0x563   :  { %v546_v37 = vmul.f32 1.442695, %v543_v36 }
 0x565   :  { %3351 = vpow2.f32 %v546_v37 }
 0x566   :  { %v3348_v38 = vpop.eup %3347  ;;  %3353 = vpow2.f32 %v544_v45 }
 0x567   :  { %v3350_v39 = vpop.eup %3349  ;;  %v349_v40 = vsel %vm333_vm12, %v3348_v38, 0.0 }
 0x568   :  { %350 = vadd.xlane.f32.xlu0 %v349_v40  ;;  %v346_v41 = vsel %vm333_vm12, %v3350_v39, 0.0 }
 0x569   :  { %347 = vadd.xlane.f32.xlu1 %v346_v41 }
 0x56f   :  { %v3352_v42 = vpop.eup %3351 }
 0x570   :  { %v551_v43 = vsel %vm333_vm12, %v3352_v42, 0.0  ;;  %v3354_v46 = vpop.eup %3353 }
 0x571   :  { %552 = vadd.xlane.f32.xlu0 %v551_v43  ;;  %v548_v47 = vsel %vm333_vm12, %v3354_v46, 0.0 }
 0x57a   :  { %3248 = vrot.lane.b32.xlu1 %v3600_v59, %s3461_s19 }
 0x587   :  { %3243 = vrot.lane.b32.xlu0 %v3600_v59, %s3462_s20 }
 0x58b   :  { %658 = vrot.lane.b32.xlu0 %v3594_v57, %s3463_s21 }
 0x59e   :  { %549 = vadd.xlane.f32.xlu1 %v548_v47 }
 0x5af   :  { %656 = vrot.lane.b32.xlu1 %v3592_v54, %s3463_s21 }
 0x5f5   :  { %v351_v48 = vpop.xlane.xlu0 %350 }
 0x5f6   :  { %3355 = vrcp.f32 %v351_v48  ;;  %v348_v52 = vpop.xlane.xlu1 %347 }
 0x5f7   :  { %3357 = vrcp.f32 %v348_v52 }
 0x5fa   :  { %v3249_v55 = vpop.permute.xlu1 %3248 }
 0x5fb   :  { %v3251_v60 = vunpack.i.h.bf16 %v3249_v55  ;;  %v3250_v0 = vunpack.i.l.bf16 %v3249_v55 }
 0x5fd   :  { %v3145_v6 = vpack.c.bf16 %v3251_v60, %v3250_v0 }
 0x5fe   :  { %v553_v53 = vpop.xlane.xlu0 %552 }
 0x5ff   :  { %3359 = vrcp.f32 %v553_v53 }
 0x600   :  { %v3356_v56 = vpop.eup %3355 }
 0x601   :  { %v3358_v58 = vpop.eup %3357  ;;  %v355_v63 = vmul.f32 %v3356_v56, %v3348_v38 }
 0x602   :  { %v3244_v61 = vpop.permute.xlu0 %3243  ;;  %v354_v62 = vmul.f32 %v3358_v58, %v3350_v39 }
 0x603   :  { %v3246_v1 = vunpack.i.h.bf16 %v3244_v61  ;;  %v3245_v3 = vunpack.i.l.bf16 %v3244_v61 }
 0x604   :  { %2936 = vmatprep.mubr.msk.f32.mxu1 %vm333_vm12, %v354_v62 }
 0x605   :  { %v3141_v4 = vpack.c.bf16 %v3246_v1, %v3245_v3  ;;  %2937 = vmatmul.mubr.msk.f32.vlgmr.msra.gmra.mrb[2].mxu1 %vm333_vm12, %v355_v63 }
 0x606   :  { %v659_v15 = vpop.permute.xlu0 %658 }
 0x607   :  { %3142 = vmatprep.subr.bf16.mxu1 %v3141_v4 }
 0x608   :  { %3144 = vmatpush3.bf16.msra.mxu1 %v3141_v4 }
 0x609   :  { %3147 = vmatprep.subr.msk.bf16.mxu1 %vm3612_vm11, %v3145_v6  ;;  %v3360_v10 = vpop.eup %3359 }
 0x60a   :  { %v557_v13 = vmul.f32 %v3360_v10, %v3352_v42 }
 0x62b   :  { %v550_v7 = vpop.xlane.xlu1 %549 }
 0x62c   :  { %3361 = vrcp.f32 %v550_v7 }
 0x62f   :  { %v657_v14 = vpop.permute.xlu1 %656 }
 0x636   :  { %v3362_v11 = vpop.eup %3361 }
 0x637   :  { %v556_v12 = vmul.f32 %v3362_v11, %v3354_v46 }
 0x639   :  { %2950 = vmatprep.mubr.msk.f32.mxu1 %vm333_vm12, %v556_v12 }
 0x63a   :  { %2951 = vmatmul.mubr.msk.f32.vlgmr.msra.gmra.mrb[4].mxu1 %vm333_vm12, %v557_v13 }
 0x63b   :  { %3150 = vmatpush3.bf16.xpose.msk.msra.mxu1 %vm3612_vm11, %v3145_v6  ;;  %2957 = vmatprep.mubr.msk.f32.mxu1 %vm249_vm10, %v657_v14 }
 0x642   :  { %2958 = vmatmul.mubr.msk.f32.vlgmr.msra.gmra.mrb[6].mxu1 %vm249_vm10, %v659_v15 }
 0x6d8   :  { %v2938_v16 = vpop.f32.mrb[2].mxu1 }
 0x6d9   :  { %444 = vst.msk [vmem:[#allocation2 + $0x8] sm:$0xff] %vm249_vm10, %v2938_v16  ;;  %v434_v17 = vpop.f32.mrb[3].mxu1 }
 0x6da   :  { %443 = vst.msk [vmem:[#allocation2] sm:$0xff] %vm249_vm10, %v434_v17 }
 0x70d   :  { %v3672_v18 = vpop.f32.mrb[4].mxu1 }
 0x70e   :  { %v3674_v19 = vpop.f32.mrb[5].mxu1 }
 0x715   :  { %v2959_v21 = vpop.f32.mrb[6].mxu1 }
 0x716   :  { %v744_v22 = vadd.f32 %v2959_v21, %v3631_v8  ;;  %v738_v24 = vpop.f32.mrb[7].mxu1 }
 0x717   :  { %v739_v25 = vadd.f32 %v738_v24, %v3636_v9 }
 0x718   :  { %v750_v26 = vsel %vm333_vm12, %v744_v22, -inf }
 0x719   :  { %751 = vmax.xlane.f32.xlu0 %v750_v26  ;;  %v747_v27 = vsel %vm333_vm12, %v739_v25, -inf }
 0x71a   :  { %748 = vmax.xlane.f32.xlu1 %v747_v27 }
 0x7a6   :  { %v752_v28 = vpop.xlane.xlu0 %751 }
 0x7a7   :  { %v754_v29 = vsub.f32 %v744_v22, %v752_v28  ;;  %v749_v30 = vpop.xlane.xlu1 %748 }
 0x7a8   :  { %v753_v31 = vsub.f32 %v739_v25, %v749_v30 }
 0x7a9   :  { %v757_v32 = vmul.f32 1.442695, %v754_v29 }
 0x7aa   :  { %v755_v33 = vmul.f32 1.442695, %v753_v31  ;;  %v3315_v31 = vld [vmem:[%s4065_s4] sm:$0xff]  }
 0x7ab   :  { %3363 = vpow2.f32 %v757_v32  ;;  %v3316_v32 = vld [vmem:[%s4065_s4 + $0x8] sm:$0xff]  }
 0x7ac   :  { %3365 = vpow2.f32 %v755_v33 }
 0x7b5   :  { %v3364_v34 = vpop.eup %3363 }
 0x7b6   :  { %v3366_v35 = vpop.eup %3365  ;;  %v762_v36 = vsel %vm333_vm12, %v3364_v34, 0.0 }
 0x7b7   :  { %763 = vadd.xlane.f32.xlu1 %v762_v36  ;;  %v759_v37 = vsel %vm333_vm12, %v3366_v35, 0.0 }
 0x7b8   :  { %760 = vadd.xlane.f32.xlu0 %v759_v37 }
 0x7c8   :  { %3258 = vrot.lane.b32.xlu1 %v3600_v59, %s3464_s22 }
 0x7cc   :  { %867 = vrot.lane.b32.xlu1 %v3592_v54, %s3465_s23 }
 0x7ce   :  { %3253 = vrot.lane.b32.xlu0 %v3600_v59, %s3466_s24 }
 0x7d2   :  { %869 = vrot.lane.b32.xlu0 %v3594_v57, %s3465_s23 }
 0x844   :  { %v764_v38 = vpop.xlane.xlu1 %763 }
 0x845   :  { %3367 = vrcp.f32 %v764_v38  ;;  %v761_v39 = vpop.xlane.xlu0 %760 }
 0x846   :  { %3369 = vrcp.f32 %v761_v39 }
 0x848   :  { %v3259_v40 = vpop.permute.xlu1 %3258 }
 0x849   :  { %v3254_v41 = vpop.permute.xlu0 %3253  ;;  %v3261_v42 = vunpack.i.h.bf16 %v3259_v40  ;;  %v3260_v43 = vunpack.i.l.bf16 %v3259_v40  ;;  %v1145_v40 = vsub.s32 1, %v3581_v49 }
 0x84a   :  { %v3256_v44 = vunpack.i.h.bf16 %v3254_v41  ;;  %v3255_v45 = vunpack.i.l.bf16 %v3254_v41 }
 0x84b   :  { %v3155_v47 = vpack.c.bf16 %v3261_v42, %v3260_v43  ;;  %v1146_v41 = vrot.slane %v3587_v51, %v1145_v40 }
 0x84c   :  { %v3151_v46 = vpack.c.bf16 %v3256_v44, %v3255_v45  ;;  %v868_v53 = vpop.permute.xlu1 %867 }
 0x84d   :  { %v870_v55 = vpop.permute.xlu0 %869 }
 0x84e   :  { %3152 = vmatprep.subr.bf16.mxu0 %v3151_v46 }
 0x84f   :  { %v3368_v54 = vpop.eup %3367  ;;  %3154 = vmatpush3.bf16.msra.mxu0 %v3151_v46 }
 0x850   :  { %v3370_v48 = vpop.eup %3369  ;;  %3157 = vmatprep.subr.msk.bf16.mxu0 %vm3612_vm11, %v3155_v47  ;;  %v768_v52 = vmul.f32 %v3368_v54, %v3364_v34 }
 0x851   :  { %v767_v57 = vmul.f32 %v3370_v48, %v3366_v35 }
 0x853   :  { %2964 = vmatprep.mubr.msk.f32.mxu0 %vm333_vm12, %v767_v57 }
 0x854   :  { %2965 = vmatmul.mubr.msk.f32.vlgmr.msra.gmra.mrb[10].mxu0 %vm333_vm12, %v768_v52 }
 0x855   :  { %2971 = vmatprep.mubr.msk.f32.mxu0 %vm249_vm10, %v868_v53 }
 0x858   :  { %3160 = vmatpush3.bf16.xpose.msk.msra.mxu0 %vm3612_vm11, %v3155_v47 }
 0x859   :  { %2989 = vmatprep.subr.bf16.mxu0 %v3455_v5 }
 0x85f   :  { %2972 = vmatmul.mubr.msk.f32.vlgmr.msra.gmra.mrb[12].mxu0 %vm249_vm10, %v870_v55 }
 0x860   :  { %2993 = vmatprep.mubr.msk.bf16.mxu0 %vm3456_vm1, %v3455_v5 }
 0x927   :  { %v2966_v56 = vpop.f32.mrb[10].mxu0 }
 0x928   :  { %v847_v58 = vpop.f32.mrb[11].mxu0 }
 0x932   :  { %v2973_v60 = vpop.f32.mrb[12].mxu0 }
 0x933   :  { %v955_v61 = vadd.f32 %v2973_v60, %v3631_v8  ;;  %v949_v62 = vpop.f32.mrb[13].mxu0 }
 0x934   :  { %v950_v63 = vadd.f32 %v949_v62, %v3636_v9 }
 0x935   :  { %v961_v0 = vsel %vm333_vm12, %v955_v61, -inf }
 0x936   :  { %962 = vmax.xlane.f32.xlu0 %v961_v0  ;;  %v958_v1 = vsel %vm333_vm12, %v950_v63, -inf  ;;  %v3317_v0 = vld [vmem:[%s4066_s5] sm:$0xff]  }
 0x937   :  { %959 = vmax.xlane.f32.xlu1 %v958_v1  ;;  %2990 = vmatpush3.bf16.msra.mxu0 %v3317_v0  ;;  %v3318_v1 = vld [vmem:[%s4066_s5 + $0x8] sm:$0xff]  }
 0x938   :  { %2991 = vmatprep.subr.bf16.mxu0 %v3455_v5 }
 0x93b   :  { %2992 = vmatpush3.bf16.msra.mxu0 %v3318_v1 }
 0x93c   :  { %3017 = vmatprep.subr.bf16.mxu0 %v3455_v5 }
 0x9c3   :  { %v963_v3 = vpop.xlane.xlu0 %962 }
 0x9c4   :  { %v965_v4 = vsub.f32 %v955_v61, %v963_v3  ;;  %v960_v6 = vpop.xlane.xlu1 %959  ;;  %v3319_v3 = vld [vmem:[%s4067_s6] sm:$0xff]  }
 0x9c5   :  { %v964_v7 = vsub.f32 %v950_v63, %v960_v6  ;;  %v3321_v6 = vld [vmem:[%s4067_s6 + $0x10] sm:$0xff]  }
 0x9c6   :  { %v968_v10 = vmul.f32 1.442695, %v965_v4  ;;  %v3320_v4 = vld [vmem:[%s4067_s6 + $0x8] sm:$0xff]  }
 0x9c7   :  { %v966_v11 = vmul.f32 1.442695, %v964_v7  ;;  %v3322_v7 = vld [vmem:[%s4067_s6 + $0x18] sm:$0xff]  }
 0x9c8   :  { %3371 = vpow2.f32 %v968_v10  ;;  %v3323_v10 = vld [vmem:[%s4067_s6 + $0x20] sm:$0xff]  }
 0x9c9   :  { %3373 = vpow2.f32 %v966_v11  ;;  %v3324_v11 = vld [vmem:[%s4067_s6 + $0x28] sm:$0xff]  }
 0x9d2   :  { %v3372_v12 = vpop.eup %3371 }
 0x9d3   :  { %v3374_v13 = vpop.eup %3373  ;;  %v973_v14 = vsel %vm333_vm12, %v3372_v12, 0.0 }
 0x9d4   :  { %974 = vadd.xlane.f32.xlu1 %v973_v14  ;;  %v970_v15 = vsel %vm333_vm12, %v3374_v13, 0.0 }
 0x9d5   :  { %971 = vadd.xlane.f32.xlu0 %v970_v15 }
 0x9e5   :  { %647 = vrot.lane.b32.xlu1 %v3674_v19, %s3467_s0 }
 0x9e9   :  { %649 = vrot.lane.b32.xlu1 %v3672_v18, %s3467_s0 }
 0x9eb   :  { %3263 = vrot.lane.b32.xlu0 %v3600_v59, %s3468_s25 }
 0x9ed   :  { %860 = vrot.lane.b32.xlu1 %v2966_v56, %s3469_s1 }
 0x9ef   :  { %858 = vrot.lane.b32.xlu0 %v847_v58, %s3469_s1 }
 0xa61   :  { %v975_v16 = vpop.xlane.xlu1 %974 }
 0xa62   :  { %3375 = vrcp.f32 %v975_v16  ;;  %v972_v17 = vpop.xlane.xlu0 %971 }
 0xa63   :  { %3377 = vrcp.f32 %v972_v17 }
 0xa65   :  { %v648_v21 = vpop.permute.xlu1 %647 }
 0xa66   :  { %654 = vst.msk [vmem:[#allocation2] sm:$0xff] %vm653_vm13, %v648_v21  ;;  %v3264_v19 = vpop.permute.xlu0 %3263 }
 0xa67   :  { %v3266_v22 = vunpack.i.h.bf16 %v3264_v19  ;;  %v3265_v18 = vunpack.i.l.bf16 %v3264_v19 }
 0xa69   :  { %v3161_v24 = vpack.c.bf16 %v3266_v22, %v3265_v18  ;;  %v650_v25 = vpop.permute.xlu1 %649 }
 0xa6a   :  { %655 = vst.msk [vmem:[#allocation2 + $0x8] sm:$0xff] %vm653_vm13, %v650_v25  ;;  %v859_v59 = vpop.permute.xlu0 %858  ;;  %v3325_v25 = vld [vmem:[%s4067_s6 + $0x30] sm:$0xff]  }
 0xa6b   :  { %865 = vst.msk [vmem:[#allocation2] sm:$0xff] %vm864_vm14, %v859_v59  ;;  %3162 = vmatprep.subr.bf16.mxu1 %v3161_v24  ;;  %v3326_v59 = vld [vmem:[%s4067_s6 + $0x38] sm:$0xff]  }
 0xa6c   :  { %v3376_v26 = vpop.eup %3375  ;;  %3164 = vmatpush3.bf16.msra.mxu1 %v3161_v24 }
 0xa6d   :  { %v3378_v27 = vpop.eup %3377  ;;  %v861_v28 = vpop.permute.xlu1 %860  ;;  %2981 = vmatprep.subr.bf16.mxu1 %v3455_v5  ;;  %v979_v30 = vmul.f32 %v3376_v26, %v3372_v12  ;;  %v1182_v26 = vsub.s32 2, %v3581_v49 }
 0xa6e   :  { %866 = vst.msk [vmem:[#allocation2 + $0x8] sm:$0xff] %vm864_vm14, %v861_v28  ;;  %v978_v29 = vmul.f32 %v3378_v27, %v3374_v13 }
 0xa6f   :  { %v1183_v27 = vrot.slane %v3587_v51, %v1182_v26 }
 0xa70   :  { %2978 = vmatprep.mubr.msk.f32.mxu1 %vm333_vm12, %v978_v29 }
 0xa71   :  { %2979 = vmatmul.mubr.msk.f32.vlgmr.msra.gmra.mrb[8].mxu1 %vm333_vm12, %v979_v30 }
 0xa72   :  { %2985 = vmatprep.mubr.msk.bf16.mxu1 %vm3456_vm1, %v3455_v5  ;;  %2982 = vmatpush3.bf16.msra.mxu1 %v3315_v31 }
 0xa73   :  { %2983 = vmatprep.subr.bf16.mxu1 %v3455_v5 }
 0xa76   :  { %2984 = vmatpush3.bf16.msra.mxu1 %v3316_v32 }
 0xa77   :  { %2997 = vmatprep.subr.bf16.mxu1 %v3455_v5 }
 0xb44   :  { %v2980_v33 = vpop.f32.mrb[8].mxu1 }
 0xb45   :  { %1071 = vrot.lane.b32.xlu1 %v2980_v33, %s3470_s30  ;;  %v1058_v34 = vpop.f32.mrb[9].mxu1 }
 0xb46   :  { %1069 = vrot.lane.b32.xlu0 %v1058_v34, %s3470_s30 }
 0xbb7   :  { %v1072_v35 = vpop.permute.xlu1 %1071 }
 0xbb8   :  { %1077 = vst.msk [vmem:[#allocation2 + $0x8] sm:$0xff] %vm1075_vm15, %v1072_v35  ;;  %v1070_v36 = vpop.permute.xlu0 %1069 }
 0xbb9   :  { %1076 = vst.msk [vmem:[#allocation2] sm:$0xff] %vm1075_vm15, %v1070_v36 }
 0xbbf   :  { %v1079_v37 = vld [vmem:[#allocation2 + $0x8] sm:$0xff] }
 0xbc0   :  { %v1078_v38 = vld [vmem:[#allocation2] sm:$0xff] }
 0xbc1   :  { %v1080_v39 = vpack.c.bf16 %v1079_v37, %v1078_v38  ;;  %v1352_v37 = vsub.s32 3, %v3581_v49 }
 0xbc3   :  { %2986 = vmatmul.mubr.msk.bf16.vlgmr.msra.gmra.mrb[12].mxu1 %vm150_vm9, %v1080_v39  ;;  %v1353_v38 = vrot.slane %v3587_v51, %v1352_v37 }
 0xbc4   :  { %3013 = vmatprep.mubr.msk.bf16.mxu1 %vm3456_vm1, %v3455_v5  ;;  %2998 = vmatpush3.bf16.msra.mxu1 %v3319_v3 }
 0xbc5   :  { %2999 = vmatprep.subr.bf16.mxu1 %v3455_v5 }
 0xbc8   :  { %3000 = vmatpush3.bf16.msra.mxu1 %v3320_v4 }
 0xbc9   :  { %3001 = vmatprep.subr.bf16.mxu1 %v3455_v5 }
 0xbcc   :  { %3002 = vmatpush3.bf16.msra.mxu1 %v3321_v6 }
 0xbcd   :  { %3003 = vmatprep.subr.bf16.mxu1 %v3455_v5 }
 0xbd0   :  { %3004 = vmatpush3.bf16.msra.mxu1 %v3322_v7 }
 0xbd1   :  { %3005 = vmatprep.subr.bf16.mxu1 %v3455_v5 }
 0xbd4   :  { %3006 = vmatpush3.bf16.msra.mxu1 %v3323_v10 }
 0xbd5   :  { %3007 = vmatprep.subr.bf16.mxu1 %v3455_v5 }
 0xbd8   :  { %3008 = vmatpush3.bf16.msra.mxu1 %v3324_v11 }
 0xbd9   :  { %3009 = vmatprep.subr.bf16.mxu1 %v3455_v5 }
 0xbdc   :  { %3010 = vmatpush3.bf16.msra.mxu1 %v3325_v25 }
 0xbdd   :  { %3011 = vmatprep.subr.bf16.mxu1 %v3455_v5 }
 0xbe0   :  { %3012 = vmatpush3.bf16.msra.mxu1 %v3326_v59 }
 0xc96   :  { %v1134_v42 = vpop.f32.mrb[12].mxu1 }
 0xc97   :  { %v1141_v43 = vadd.f32 %v1134_v42, %v3561_v20  ;;  %v2987_v44 = vpop.f32.mrb[13].mxu1 }
 0xc98   :  { %v1137_v45 = vpop.f32.mrb[14].mxu1 }
 0xc99   :  { %v3744_v46 = vadd.f32 %v1146_v41, %v1141_v43  ;;  %v1142_v47 = vadd.f32 %v1137_v45, %v3565_v23  ;;  %v2988_v54 = vpop.f32.mrb[15].mxu1 }
 0xc9b   :  { %v3747_v48 = vadd.f32 %v1146_v41, %v1142_v47  ;;  %v1149_v57 = vsel %vm150_vm9, %v3744_v46, 0.0 }
 0xc9c   :  { %1150 = vadd.xlane.f32.xlu0 %v1149_v57 }
 0xc9d   :  { %v1152_v52 = vsel %vm150_vm9, %v3747_v48, 0.0 }
 0xc9e   :  { %1153 = vadd.xlane.f32.xlu1 %v1152_v52 }
 0xd29   :  { %v1151_v53 = vpop.xlane.xlu0 %1150 }
 0xd2a   :  { %v1155_v55 = vmul.f32 0.03125, %v1151_v53 }
 0xd2b   :  { %v1154_v20 = vpop.xlane.xlu1 %1153 }
 0xd2c   :  { %v1157_v56 = vsub.f32 %v3744_v46, %v1155_v55  ;;  %v1156_v58 = vmul.f32 0.03125, %v1154_v20 }
 0xd2e   :  { %v1158_v60 = vsub.f32 %v3747_v48, %v1156_v58  ;;  %v1159_v23 = vmul.f32 %v1157_v56, %v1157_v56 }
 0xd30   :  { %v1161_v61 = vsel %vm150_vm9, %v1159_v23, 0.0  ;;  %v1160_v62 = vmul.f32 %v1158_v60, %v1158_v60 }
 0xd31   :  { %1162 = vadd.xlane.f32.xlu0 %v1161_v61  ;;  %v3327_v61 = vld [vmem:[%s4064_s3 + $0x10] sm:$0xff]  }
 0xd32   :  { %v1164_v63 = vsel %vm150_vm9, %v1160_v62, 0.0  ;;  %v3328_v62 = vld [vmem:[%s4064_s3 + $0x18] sm:$0xff]  }
 0xd35   :  { %1165 = vadd.xlane.f32.xlu0 %v1164_v63 }
 0xdbe   :  { %v1163_v12 = vpop.xlane.xlu0 %1162 }
 0xdbf   :  { %v1167_v13 = vmul.f32 0.03125, %v1163_v12 }
 0xdc1   :  { %v1169_v14 = vadd.f32 1e-05, %v1167_v13 }
 0xdc2   :  { %v1166_v15 = vpop.xlane.xlu0 %1165 }
 0xdc3   :  { %v1168_v16 = vmul.f32 0.03125, %v1166_v15  ;;  %3379 = vrsqrt.f32 %v1169_v14  ;;  %v3832_v14 = vld [vmem:[%s4068_s7 + $0x4] sm:$0xf] }
 0xdc4   :  { %v1393_v15 = vrot.slane %v3832_v14, %v185_v50 }
 0xdc5   :  { %v1170_v17 = vadd.f32 1e-05, %v1168_v16 }
 0xdc7   :  { %3381 = vrsqrt.f32 %v1170_v17 }
 0xdcd   :  { %v3380_v21 = vpop.eup %3379 }
 0xdce   :  { %v1173_v22 = vmul.f32 %v3380_v21, %v1157_v56 }
 0xdd1   :  { %v3382_v19 = vpop.eup %3381 }
 0xdd2   :  { %v1174_v18 = vmul.f32 %v3382_v19, %v1158_v60 }
 0xdd4   :  { %v1175_v24 = vpack.c.bf16 %v1174_v18, %v1173_v22 }
 0xdd6   :  { %2994 = vmatmul.mubr.msk.bf16.vlgmr.msra.gmra.mrb[16].mxu0 %vm150_vm9, %v1175_v24 }
 0xdd7   :  { %3021 = vmatprep.mubr.msk.bf16.mxu0 %vm3456_vm1, %v3455_v5  ;;  %3018 = vmatpush3.bf16.msra.mxu0 %v3327_v61 }
 0xdd8   :  { %3019 = vmatprep.subr.bf16.mxu0 %v3455_v5 }
 0xddb   :  { %3020 = vmatpush3.bf16.msra.mxu0 %v3328_v62 }
 0xea9   :  { %v1233_v28 = vpop.f32.mrb[16].mxu0 }
 0xeaa   :  { %v1234_v29 = vadd.f32 %v1233_v28, %v1183_v27  ;;  %v2995_v30 = vpop.f32.mrb[17].mxu0 }
 0xeab   :  { %v1236_v31 = vpop.f32.mrb[18].mxu0 }
 0xeac   :  { %v1237_v32 = vadd.f32 %v1236_v31, %v1183_v27  ;;  %v2996_v33 = vpop.f32.mrb[19].mxu0  ;;  %v1240_v34 = vmax.f32 %v1234_v29, 0.0 }
 0xeae   :  { %v1241_v35 = vmax.f32 %v1237_v32, 0.0 }
 0xeb0   :  { %v1242_v36 = vpack.c.bf16 %v1241_v35, %v1240_v34 }
 0xeb2   :  { %3014 = vmatmul.mubr.bf16.vlgmr.msra.gmra.mrb[16].mxu1 %v1242_v36 }
 0xf85   :  { %v1341_v39 = vpop.f32.mrb[16].mxu1 }
 0xf86   :  { %v1348_v41 = vadd.f32 %v1341_v39, %v3744_v46  ;;  %v3015_v42 = vpop.f32.mrb[17].mxu1 }
 0xf87   :  { %v1344_v43 = vpop.f32.mrb[18].mxu1 }
 0xf88   :  { %v3808_v44 = vadd.f32 %v1353_v38, %v1348_v41  ;;  %v1349_v45 = vadd.f32 %v1344_v43, %v3747_v48  ;;  %v3016_v47 = vpop.f32.mrb[19].mxu1 }
 0xf8a   :  { %v3811_v54 = vadd.f32 %v1353_v38, %v1349_v45  ;;  %v1358_v57 = vsel %vm150_vm9, %v3808_v44, 0.0 }
 0xf8b   :  { %1359 = vadd.xlane.f32.xlu1 %v1358_v57 }
 0xf8c   :  { %v1361_v52 = vsel %vm150_vm9, %v3811_v54, 0.0 }
 0xf8d   :  { %1362 = vadd.xlane.f32.xlu0 %v1361_v52 }
0x1018   :  { %v1360_v51 = vpop.xlane.xlu1 %1359 }
0x1019   :  { %v1364_v53 = vmul.f32 0.03125, %v1360_v51 }
0x101a   :  { %v1363_v46 = vpop.xlane.xlu0 %1362 }
0x101b   :  { %v1366_v55 = vsub.f32 %v3808_v44, %v1364_v53  ;;  %v1365_v20 = vmul.f32 0.03125, %v1363_v46 }
0x101d   :  { %v1367_v56 = vsub.f32 %v3811_v54, %v1365_v20  ;;  %v1368_v48 = vmul.f32 %v1366_v55, %v1366_v55 }
0x101f   :  { %v1370_v58 = vsel %vm150_vm9, %v1368_v48, 0.0  ;;  %v1369_v60 = vmul.f32 %v1367_v56, %v1367_v56 }
0x1020   :  { %1371 = vadd.xlane.f32.xlu1 %v1370_v58 }
0x1021   :  { %v1373_v23 = vsel %vm150_vm9, %v1369_v60, 0.0 }
0x1022   :  { %1374 = vadd.xlane.f32.xlu0 %v1373_v23 }
0x10ad   :  { %v1372_v63 = vpop.xlane.xlu1 %1371 }
0x10ae   :  { %v1376_v0 = vmul.f32 0.03125, %v1372_v63 }
0x10af   :  { %v1375_v1 = vpop.xlane.xlu0 %1374 }
0x10b0   :  { %v1378_v3 = vadd.f32 1e-05, %v1376_v0  ;;  %v1377_v4 = vmul.f32 0.03125, %v1375_v1 }
0x10b2   :  { %3383 = vrsqrt.f32 %v1378_v3  ;;  %v1379_v6 = vadd.f32 1e-05, %v1377_v4 }
0x10b4   :  { %3385 = vrsqrt.f32 %v1379_v6 }
0x10bc   :  { %v3384_v7 = vpop.eup %3383 }
0x10bd   :  { %v1382_v11 = vmul.f32 %v3384_v7, %v1366_v55 }
0x10be   :  { %v3386_v10 = vpop.eup %3385 }
0x10bf   :  { %v1383_v12 = vmul.f32 %v3386_v10, %v1367_v56 }
0x10c1   :  { %v1384_v13 = vpack.c.bf16 %v1383_v12, %v1382_v11 }
0x10c3   :  { %3022 = vmatmul.mubr.msk.bf16.vlgmr.msra.gmra.mrb[20].mxu0 %vm150_vm9, %v1384_v13 }
0x1196   :  { %v1443_v16 = vpop.f32.mrb[20].mxu0 }
0x1197   :  { %v3837_v17 = vadd.f32 %v1443_v16, %v1393_v15  ;;  %v3023_v21 = vpop.f32.mrb[21].mxu0 }
0x1198   :  { %v1446_v19 = vpop.f32.mrb[22].mxu0 }
0x1199   :  { %v3839_v22 = vadd.f32 %v1446_v19, %v1393_v15  ;;  %v3024_v18 = vpop.f32.mrb[23].mxu0  ;;  %3029 = vmatprep.mubr.msk.f32.mxu0 %vm249_vm10, %v3837_v17 }
0x119b   :  { %v3845_v24 = vpack.i.bf16 %v3839_v22, %v3837_v17 }
0x119d   :  { %3268 = vrot.lane.b32.xlu1 %v3845_v24, %s3458_s12 }
0x11a1   :  { %3273 = vrot.lane.b32.xlu1 %v3845_v24, %s3460_s18 }
0x11a5   :  { %1650 = vrot.lane.b32.xlu1 %v3837_v17, %s3459_s13 }
0x11a9   :  { %3283 = vrot.lane.b32.xlu1 %v3845_v24, %s3461_s19 }
0x11ad   :  { %1652 = vrot.lane.b32.xlu1 %v3839_v22, %s3459_s13 }
0x11b1   :  { %1860 = vrot.lane.b32.xlu1 %v3837_v17, %s3463_s21 }
0x11b5   :  { %1862 = vrot.lane.b32.xlu1 %v3839_v22, %s3463_s21 }
0x120f   :  { %v3269_v50 = vpop.permute.xlu1 %3268 }
0x1210   :  { %v3271_v25 = vunpack.i.h.bf16 %v3269_v50  ;;  %v3270_v59 = vunpack.i.l.bf16 %v3269_v50 }
0x1212   :  { %v3165_v27 = vpack.c.bf16 %v3271_v25, %v3270_v59 }
0x1213   :  { %v3274_v28 = vpop.permute.xlu1 %3273 }
0x1214   :  { %v3276_v29 = vunpack.i.h.bf16 %v3274_v28  ;;  %v3275_v30 = vunpack.i.l.bf16 %v3274_v28  ;;  %3167 = vmatprep.subr.msk.bf16.mxu0 %vm3612_vm11, %v3165_v27 }
0x1215   :  { %3170 = vmatpush3.bf16.xpose.msk.msra.mxu0 %vm3612_vm11, %v3165_v27 }
0x1216   :  { %v3171_v31 = vpack.c.bf16 %v3276_v29, %v3275_v30 }
0x1217   :  { %v1651_v32 = vpop.permute.xlu1 %1650 }
0x1218   :  { %3172 = vmatprep.subr.bf16.mxu0 %v3171_v31 }
0x121b   :  { %v3284_v33 = vpop.permute.xlu1 %3283 }
0x121c   :  { %v3286_v34 = vunpack.i.h.bf16 %v3284_v33  ;;  %v3285_v35 = vunpack.i.l.bf16 %v3284_v33  ;;  %3030 = vmatmul.mubr.msk.f32.vlgmr.msra.gmra.mrb[14].mxu0 %vm249_vm10, %v3839_v22 }
0x121d   :  { %3174 = vmatpush3.bf16.msra.mxu0 %v3171_v31 }
0x121e   :  { %v3185_v36 = vpack.c.bf16 %v3286_v34, %v3285_v35 }
0x121f   :  { %v1653_v38 = vpop.permute.xlu1 %1652 }
0x1220   :  { %3187 = vmatprep.subr.msk.bf16.mxu1 %vm3612_vm11, %v3185_v36 }
0x1221   :  { %3190 = vmatpush3.bf16.xpose.msk.msra.mxu1 %vm3612_vm11, %v3185_v36 }
0x1223   :  { %v1861_v39 = vpop.permute.xlu1 %1860 }
0x1224   :  { %3057 = vmatprep.mubr.msk.f32.mxu1 %vm249_vm10, %v1861_v39 }
0x1227   :  { %v1863_v41 = vpop.permute.xlu1 %1862 }
0x1228   :  { %3058 = vmatmul.mubr.msk.f32.vlgmr.msra.gmra.mrb[10].mxu1 %vm249_vm10, %v1863_v41 }
0x12ef   :  { %v3031_v42 = vpop.f32.mrb[14].mxu0 }
0x12f0   :  { %v1530_v43 = vpop.f32.mrb[15].mxu0  ;;  %v1536_v47 = vadd.f32 %v3031_v42, %v3631_v8 }
0x12f1   :  { %v1531_v45 = vadd.f32 %v1530_v43, %v3636_v9 }
0x12f2   :  { %v1542_v52 = vsel %vm333_vm12, %v1536_v47, -inf }
0x12f3   :  { %v1539_v57 = vsel %vm333_vm12, %v1531_v45, -inf }
0x12f4   :  { %1540 = vmax.xlane.f32.xlu0 %v1539_v57 }
0x12f8   :  { %1543 = vmax.xlane.f32.xlu0 %v1542_v52 }
0x12fb   :  { %v3059_v51 = vpop.f32.mrb[10].mxu1 }
0x12fc   :  { %v1942_v53 = vpop.f32.mrb[11].mxu1  ;;  %v1948_v27 = vadd.f32 %v3059_v51, %v3631_v8 }
0x12fd   :  { %v1943_v25 = vadd.f32 %v1942_v53, %v3636_v9 }
0x12fe   :  { %v1954_v29 = vsel %vm333_vm12, %v1948_v27, -inf }
0x12ff   :  { %v1951_v28 = vsel %vm333_vm12, %v1943_v25, -inf }
0x1381   :  { %v1541_v46 = vpop.xlane.xlu0 %1540 }
0x1382   :  { %v1545_v55 = vsub.f32 %v1531_v45, %v1541_v46 }
0x1384   :  { %v1547_v48 = vmul.f32 1.442695, %v1545_v55 }
0x1385   :  { %v1544_v20 = vpop.xlane.xlu0 %1543 }
0x1386   :  { %v1546_v56 = vsub.f32 %v1536_v47, %v1544_v20 }
0x1388   :  { %v1549_v58 = vmul.f32 1.442695, %v1546_v56 }
0x138a   :  { %3387 = vpow2.f32 %v1549_v58 }
0x138b   :  { %3389 = vpow2.f32 %v1547_v48 }
0x1394   :  { %v3388_v60 = vpop.eup %3387 }
0x1395   :  { %v1554_v23 = vsel %vm333_vm12, %v3388_v60, 0.0  ;;  %v3390_v61 = vpop.eup %3389 }
0x1396   :  { %1555 = vadd.xlane.f32.xlu0 %v1554_v23  ;;  %v1551_v62 = vsel %vm333_vm12, %v3390_v61, 0.0 }
0x139a   :  { %1552 = vadd.xlane.f32.xlu0 %v1551_v62 }
0x13b0   :  { %3278 = vrot.lane.b32.xlu0 %v3845_v24, %s3457_s11 }
0x1423   :  { %v1556_v63 = vpop.xlane.xlu0 %1555 }
0x1424   :  { %3391 = vrcp.f32 %v1556_v63 }
0x1427   :  { %v1553_v0 = vpop.xlane.xlu0 %1552 }
0x1428   :  { %3393 = vrcp.f32 %v1553_v0 }
0x142b   :  { %v3279_v1 = vpop.permute.xlu0 %3278 }
0x142c   :  { %v3281_v3 = vunpack.i.h.bf16 %v3279_v1  ;;  %v3280_v4 = vunpack.i.l.bf16 %v3279_v1 }
0x142e   :  { %v3175_v6 = vpack.c.bf16 %v3281_v3, %v3280_v4  ;;  %v3392_v7 = vpop.eup %3391 }
0x142f   :  { %v1560_v12 = vmul.f32 %v3392_v7, %v3388_v60 }
0x1430   :  { %3177 = vmatprep.subr.msk.bf16.mxu0 %vm3612_vm11, %v3175_v6 }
0x1432   :  { %v3394_v10 = vpop.eup %3393 }
0x1433   :  { %v1559_v11 = vmul.f32 %v3394_v10, %v3390_v61 }
0x1435   :  { %3036 = vmatprep.mubr.msk.f32.mxu0 %vm333_vm12, %v1559_v11 }
0x1436   :  { %3037 = vmatmul.mubr.msk.f32.vlgmr.msra.gmra.mrb[24].mxu0 %vm333_vm12, %v1560_v12 }
0x1437   :  { %3180 = vmatpush3.bf16.xpose.msk.msra.mxu0 %vm3612_vm11, %v3175_v6  ;;  %3043 = vmatprep.mubr.msk.f32.mxu0 %vm249_vm10, %v1651_v32 }
0x143e   :  { %3044 = vmatmul.mubr.msk.f32.vlgmr.msra.gmra.mrb[26].mxu0 %vm249_vm10, %v1653_v38 }
0x1509   :  { %v3038_v13 = vpop.f32.mrb[24].mxu0 }
0x150a   :  { %1649 = vst.msk [vmem:[#allocation2 + $0x8] sm:$0xff] %vm249_vm10, %v3038_v13  ;;  %v1639_v15 = vpop.f32.mrb[25].mxu0 }
0x150b   :  { %1648 = vst.msk [vmem:[#allocation2] sm:$0xff] %vm249_vm10, %v1639_v15 }
0x1511   :  { %v3045_v16 = vpop.f32.mrb[26].mxu0 }
0x1512   :  { %v1738_v21 = vadd.f32 %v3045_v16, %v3631_v8  ;;  %v1732_v19 = vpop.f32.mrb[27].mxu0 }
0x1513   :  { %v1733_v18 = vadd.f32 %v1732_v19, %v3636_v9 }
0x1514   :  { %v1744_v50 = vsel %vm333_vm12, %v1738_v21, -inf }
0x1515   :  { %1745 = vmax.xlane.f32.xlu1 %v1744_v50  ;;  %v1741_v59 = vsel %vm333_vm12, %v1733_v18, -inf }
0x1516   :  { %1742 = vmax.xlane.f32.xlu0 %v1741_v59 }
0x151a   :  { %1952 = vmax.xlane.f32.xlu0 %v1951_v28 }
0x151e   :  { %1955 = vmax.xlane.f32.xlu0 %v1954_v29  ;;  %v3428_v29 = vld [vmem:[%s4063_s2] sm:$0xff] }
0x15a2   :  { %v1746_v31 = vpop.xlane.xlu1 %1745 }
0x15a3   :  { %v1743_v30 = vpop.xlane.xlu0 %1742  ;;  %v1748_v34 = vsub.f32 %v1738_v21, %v1746_v31 }
0x15a4   :  { %v1747_v57 = vsub.f32 %v1733_v18, %v1743_v30 }
0x15a5   :  { %v1751_v38 = vmul.f32 1.442695, %v1748_v34 }
0x15a6   :  { %v1749_v52 = vmul.f32 1.442695, %v1747_v57 }
0x15a7   :  { %v1953_v32 = vpop.xlane.xlu0 %1952 }
0x15a8   :  { %v1957_v33 = vsub.f32 %v1943_v25, %v1953_v32 }
0x15aa   :  { %v1959_v35 = vmul.f32 1.442695, %v1957_v33 }
0x15ab   :  { %v1956_v36 = vpop.xlane.xlu0 %1955 }
0x15ac   :  { %3395 = vpow2.f32 %v1959_v35  ;;  %v1958_v9 = vsub.f32 %v1948_v27, %v1956_v36  ;;  %v3427_v27 = vld [vmem:[%s4063_s2 + $0x8] sm:$0xff] }
0x15ae   :  { %v1961_v39 = vmul.f32 1.442695, %v1958_v9 }
0x15b0   :  { %3397 = vpow2.f32 %v1961_v39 }
0x15b1   :  { %3399 = vpow2.f32 %v1751_v38 }
0x15b2   :  { %3401 = vpow2.f32 %v1749_v52 }
0x15b6   :  { %v3396_v8 = vpop.eup %3395 }
0x15b7   :  { %v1963_v41 = vsel %vm333_vm12, %v3396_v8, 0.0 }
0x15b8   :  { %1964 = vadd.xlane.f32.xlu1 %v1963_v41 }
0x15ba   :  { %v3398_v42 = vpop.eup %3397 }
0x15bb   :  { %v1966_v43 = vsel %vm333_vm12, %v3398_v42, 0.0  ;;  %v3400_v45 = vpop.eup %3399 }
0x15bc   :  { %1967 = vadd.xlane.f32.xlu0 %v1966_v43  ;;  %v1756_v47 = vsel %vm333_vm12, %v3400_v45, 0.0  ;;  %v3402_v51 = vpop.eup %3401 }
0x15bd   :  { %v1753_v53 = vsel %vm333_vm12, %v3402_v51, 0.0 }
0x15c0   :  { %1757 = vadd.xlane.f32.xlu0 %v1756_v47 }
0x15c9   :  { %3288 = vrot.lane.b32.xlu1 %v3845_v24, %s3462_s20 }
0x15d6   :  { %3293 = vrot.lane.b32.xlu0 %v3845_v24, %s3466_s24 }
0x15da   :  { %2072 = vrot.lane.b32.xlu0 %v3839_v22, %s3465_s23 }
0x15ed   :  { %1754 = vadd.xlane.f32.xlu1 %v1753_v53 }
0x15fe   :  { %3298 = vrot.lane.b32.xlu1 %v3845_v24, %s3464_s22 }
0x1602   :  { %2070 = vrot.lane.b32.xlu1 %v3837_v17, %s3465_s23 }
0x1645   :  { %v1965_v46 = vpop.xlane.xlu1 %1964 }
0x1646   :  { %3403 = vrcp.f32 %v1965_v46 }
0x1649   :  { %v3289_v55 = vpop.permute.xlu1 %3288  ;;  %v1968_v20 = vpop.xlane.xlu0 %1967 }
0x164a   :  { %v3291_v56 = vunpack.i.h.bf16 %v3289_v55  ;;  %v3290_v48 = vunpack.i.l.bf16 %v3289_v55 }
0x164c   :  { %v3181_v58 = vpack.c.bf16 %v3291_v56, %v3290_v48 }
0x164d   :  { %v1758_v60 = vpop.xlane.xlu0 %1757 }
0x164e   :  { %3182 = vmatprep.subr.bf16.mxu0 %v3181_v58  ;;  %3405 = vrcp.f32 %v1758_v60  ;;  %v3329_v60 = vld [vmem:[%s4065_s4 + $0x10] sm:$0xff]  }
0x164f   :  { %3184 = vmatpush3.bf16.msra.mxu0 %v3181_v58 }
0x1650   :  { %v3404_v0 = vpop.eup %3403 }
0x1651   :  { %v3294_v22 = vpop.permute.xlu0 %3293  ;;  %v1971_v12 = vmul.f32 %v3404_v0, %v3396_v8 }
0x1652   :  { %v3296_v23 = vunpack.i.h.bf16 %v3294_v22  ;;  %v3295_v61 = vunpack.i.l.bf16 %v3294_v22  ;;  %v3330_v22 = vld [vmem:[%s4065_s4 + $0x18] sm:$0xff]  }
0x1654   :  { %v3191_v62 = vpack.c.bf16 %v3296_v23, %v3295_v61 }
0x1655   :  { %v2073_v21 = vpop.permute.xlu0 %2072 }
0x1656   :  { %3192 = vmatprep.subr.bf16.mxu0 %v3191_v62 }
0x1658   :  { %v3406_v1 = vpop.eup %3405 }
0x1659   :  { %v1762_v10 = vmul.f32 %v3406_v1, %v3400_v45 }
0x167a   :  { %v1755_v63 = vpop.xlane.xlu1 %1754 }
0x167b   :  { %3407 = vrcp.f32 %v1755_v63 }
0x167c   :  { %3409 = vrcp.f32 %v1968_v20 }
0x167e   :  { %v3299_v17 = vpop.permute.xlu1 %3298 }
0x167f   :  { %v3301_v4 = vunpack.i.h.bf16 %v3299_v17  ;;  %v3300_v6 = vunpack.i.l.bf16 %v3299_v17 }
0x1681   :  { %v3195_v13 = vpack.c.bf16 %v3301_v4, %v3300_v6 }
0x1682   :  { %v2071_v16 = vpop.permute.xlu1 %2070 }
0x1685   :  { %v3408_v3 = vpop.eup %3407 }
0x1686   :  { %v1761_v7 = vmul.f32 %v3408_v3, %v3402_v51  ;;  %v3410_v11 = vpop.eup %3409  ;;  %v2349_v3 = vrot.slane %v3832_v14, %v1145_v40 }
0x1687   :  { %v1972_v15 = vmul.f32 %v3410_v11, %v3398_v42 }
0x1688   :  { %3050 = vmatprep.mubr.msk.f32.mxu0 %vm333_vm12, %v1761_v7 }
0x1689   :  { %3051 = vmatmul.mubr.msk.f32.vlgmr.msra.gmra.mrb[28].mxu0 %vm333_vm12, %v1762_v10 }
0x168a   :  { %3194 = vmatpush3.bf16.msra.mxu0 %v3191_v62  ;;  %3064 = vmatprep.mubr.msk.f32.mxu0 %vm333_vm12, %v1971_v12 }
0x168b   :  { %3197 = vmatprep.subr.msk.bf16.mxu0 %vm3612_vm11, %v3195_v13 }
0x168d   :  { %3065 = vmatmul.mubr.msk.f32.vlgmr.msra.gmra.mrb[30].mxu0 %vm333_vm12, %v1972_v15 }
0x168e   :  { %3071 = vmatprep.mubr.msk.f32.mxu0 %vm249_vm10, %v2071_v16 }
0x1693   :  { %3200 = vmatpush3.bf16.xpose.msk.msra.mxu0 %vm3612_vm11, %v3195_v13 }
0x1694   :  { %3089 = vmatprep.subr.bf16.mxu0 %v3455_v5 }
0x169a   :  { %3072 = vmatmul.mubr.msk.f32.vlgmr.msra.gmra.mrb[32].mxu0 %vm249_vm10, %v2073_v21 }
0x169b   :  { %3093 = vmatprep.mubr.msk.bf16.mxu0 %vm3456_vm1, %v3455_v5 }
0x175c   :  { %v3052_v19 = vpop.f32.mrb[28].mxu0 }
0x175d   :  { %v1841_v18 = vpop.f32.mrb[29].mxu0 }
0x1760   :  { %v3066_v50 = vpop.f32.mrb[30].mxu0 }
0x1761   :  { %v2051_v25 = vpop.f32.mrb[31].mxu0 }
0x176d   :  { %v3073_v59 = vpop.f32.mrb[32].mxu0 }
0x176e   :  { %v2158_v28 = vadd.f32 %v3427_v27, %v3073_v59  ;;  %v2152_v2 = vpop.f32.mrb[33].mxu0 }
0x176f   :  { %v2153_v30 = vadd.f32 %v3428_v29, %v2152_v2  ;;  %v3331_v2 = vld [vmem:[%s4066_s5 + $0x10] sm:$0xff]   ;;  %v3332_v29 = vld [vmem:[%s4066_s5 + $0x18] sm:$0xff]  }
0x1770   :  { %v2164_v31 = vsel %vm333_vm12, %v2158_v28, -inf  ;;  %3090 = vmatpush3.bf16.msra.mxu0 %v3331_v2 }
0x1771   :  { %2165 = vmax.xlane.f32.xlu0 %v2164_v31  ;;  %v2161_v32 = vsel %vm333_vm12, %v2153_v30, -inf  ;;  %3091 = vmatprep.subr.bf16.mxu0 %v3455_v5  ;;  %v3334_v31 = vld [vmem:[%s4067_s6 + $0x48] sm:$0xff]  }
0x1772   :  { %2162 = vmax.xlane.f32.xlu1 %v2161_v32  ;;  %v3335_v32 = vld [vmem:[%s4067_s6 + $0x50] sm:$0xff]  }
0x1774   :  { %3092 = vmatpush3.bf16.msra.mxu0 %v3332_v29 }
0x1775   :  { %3117 = vmatprep.subr.bf16.mxu0 %v3455_v5 }
0x17fe   :  { %v2166_v33 = vpop.xlane.xlu0 %2165 }
0x17ff   :  { %v2168_v34 = vsub.f32 %v2158_v28, %v2166_v33  ;;  %v2163_v35 = vpop.xlane.xlu1 %2162  ;;  %v3336_v33 = vld [vmem:[%s4067_s6 + $0x58] sm:$0xff]  }
0x1800   :  { %v2167_v36 = vsub.f32 %v2153_v30, %v2163_v35  ;;  %v3333_v30 = vld [vmem:[%s4067_s6 + $0x40] sm:$0xff]   ;;  %v3338_v35 = vld [vmem:[%s4067_s6 + $0x68] sm:$0xff]  }
0x1801   :  { %v2171_v9 = vmul.f32 1.442695, %v2168_v34  ;;  %v3337_v34 = vld [vmem:[%s4067_s6 + $0x60] sm:$0xff]  }
0x1802   :  { %v2169_v38 = vmul.f32 1.442695, %v2167_v36 }
0x1803   :  { %3411 = vpow2.f32 %v2171_v9 }
0x1804   :  { %3413 = vpow2.f32 %v2169_v38 }
0x180d   :  { %v3412_v39 = vpop.eup %3411 }
0x180e   :  { %v3414_v8 = vpop.eup %3413  ;;  %v2176_v41 = vsel %vm333_vm12, %v3412_v39, 0.0 }
0x180f   :  { %2177 = vadd.xlane.f32.xlu1 %v2176_v41  ;;  %v2173_v42 = vsel %vm333_vm12, %v3414_v8, 0.0 }
0x1810   :  { %2174 = vadd.xlane.f32.xlu0 %v2173_v42 }
0x1820   :  { %1852 = vrot.lane.b32.xlu1 %v1841_v18, %s3467_s0 }
0x1824   :  { %1854 = vrot.lane.b32.xlu1 %v3052_v19, %s3467_s0 }
0x1826   :  { %3303 = vrot.lane.b32.xlu0 %v3845_v24, %s3468_s25 }
0x1828   :  { %2064 = vrot.lane.b32.xlu1 %v3066_v50, %s3469_s1 }
0x182a   :  { %2062 = vrot.lane.b32.xlu0 %v2051_v25, %s3469_s1 }
0x189c   :  { %v2178_v43 = vpop.xlane.xlu1 %2177 }
0x189d   :  { %3415 = vrcp.f32 %v2178_v43  ;;  %v2175_v45 = vpop.xlane.xlu0 %2174 }
0x189e   :  { %3417 = vrcp.f32 %v2175_v45 }
0x18a0   :  { %v1853_v47 = vpop.permute.xlu1 %1852 }
0x18a1   :  { %1858 = vst.msk [vmem:[#allocation2] sm:$0xff] %vm653_vm13, %v1853_v47  ;;  %v3304_v57 = vpop.permute.xlu0 %3303 }
0x18a2   :  { %v3306_v52 = vunpack.i.h.bf16 %v3304_v57  ;;  %v3305_v51 = vunpack.i.l.bf16 %v3304_v57 }
0x18a4   :  { %v3201_v53 = vpack.c.bf16 %v3306_v52, %v3305_v51  ;;  %v1855_v46 = vpop.permute.xlu1 %1854  ;;  %v3339_v52 = vld [vmem:[%s4067_s6 + $0x70] sm:$0xff]   ;;  %v3340_v51 = vld [vmem:[%s4067_s6 + $0x78] sm:$0xff]  }
0x18a5   :  { %1859 = vst.msk [vmem:[#allocation2 + $0x8] sm:$0xff] %vm653_vm13, %v1855_v46  ;;  %v2063_v55 = vpop.permute.xlu0 %2062 }
0x18a6   :  { %2068 = vst.msk [vmem:[#allocation2] sm:$0xff] %vm864_vm14, %v2063_v55  ;;  %3202 = vmatprep.subr.bf16.mxu1 %v3201_v53 }
0x18a7   :  { %v3416_v24 = vpop.eup %3415  ;;  %3204 = vmatpush3.bf16.msra.mxu1 %v3201_v53  ;;  %v2387_v53 = vrot.slane %v3832_v14, %v1182_v26 }
0x18a8   :  { %v3418_v20 = vpop.eup %3417  ;;  %v2065_v56 = vpop.permute.xlu1 %2064  ;;  %3081 = vmatprep.subr.bf16.mxu1 %v3455_v5  ;;  %v2182_v58 = vmul.f32 %v3416_v24, %v3412_v39 }
0x18a9   :  { %2069 = vst.msk [vmem:[#allocation2 + $0x8] sm:$0xff] %vm864_vm14, %v2065_v56  ;;  %v2181_v48 = vmul.f32 %v3418_v20, %v3414_v8 }
0x18ab   :  { %3078 = vmatprep.mubr.msk.f32.mxu1 %vm333_vm12, %v2181_v48 }
0x18ac   :  { %3079 = vmatmul.mubr.msk.f32.vlgmr.msra.gmra.mrb[20].mxu1 %vm333_vm12, %v2182_v58 }
0x18ad   :  { %3085 = vmatprep.mubr.msk.bf16.mxu1 %vm3456_vm1, %v3455_v5  ;;  %3082 = vmatpush3.bf16.msra.mxu1 %v3329_v60 }
0x18ae   :  { %3083 = vmatprep.subr.bf16.mxu1 %v3455_v5 }
0x18b1   :  { %3084 = vmatpush3.bf16.msra.mxu1 %v3330_v22 }
0x18b2   :  { %3097 = vmatprep.subr.bf16.mxu1 %v3455_v5 }
0x197f   :  { %v3080_v23 = vpop.f32.mrb[20].mxu1 }
0x1980   :  { %2274 = vrot.lane.b32.xlu1 %v3080_v23, %s3470_s30  ;;  %v2261_v61 = vpop.f32.mrb[21].mxu1  ;;  %v2558_v23 = vrot.slane %v3832_v14, %v1352_v37 }
0x1981   :  { %2272 = vrot.lane.b32.xlu0 %v2261_v61, %s3470_s30 }
0x19f2   :  { %v2275_v62 = vpop.permute.xlu1 %2274 }
0x19f3   :  { %2279 = vst.msk [vmem:[#allocation2 + $0x8] sm:$0xff] %vm1075_vm15, %v2275_v62  ;;  %v2273_v63 = vpop.permute.xlu0 %2272 }
0x19f4   :  { %2278 = vst.msk [vmem:[#allocation2] sm:$0xff] %vm1075_vm15, %v2273_v63 }
0x19fa   :  { %v2281_v17 = vld [vmem:[#allocation2 + $0x8] sm:$0xff] }
0x19fb   :  { %v2280_v0 = vld [vmem:[#allocation2] sm:$0xff] }
0x19fc   :  { %v2282_v1 = vpack.c.bf16 %v2281_v17, %v2280_v0 }
0x19fe   :  { %3086 = vmatmul.mubr.msk.bf16.vlgmr.msra.gmra.mrb[24].mxu1 %vm150_vm9, %v2282_v1 }
0x19ff   :  { %3113 = vmatprep.mubr.msk.bf16.mxu1 %vm3456_vm1, %v3455_v5  ;;  %3098 = vmatpush3.bf16.msra.mxu1 %v3333_v30 }
0x1a00   :  { %3099 = vmatprep.subr.bf16.mxu1 %v3455_v5 }
0x1a03   :  { %3100 = vmatpush3.bf16.msra.mxu1 %v3334_v31 }
0x1a04   :  { %3101 = vmatprep.subr.bf16.mxu1 %v3455_v5 }
0x1a07   :  { %3102 = vmatpush3.bf16.msra.mxu1 %v3335_v32 }
0x1a08   :  { %3103 = vmatprep.subr.bf16.mxu1 %v3455_v5 }
0x1a0b   :  { %3104 = vmatpush3.bf16.msra.mxu1 %v3336_v33 }
0x1a0c   :  { %3105 = vmatprep.subr.bf16.mxu1 %v3455_v5 }
0x1a0f   :  { %3106 = vmatpush3.bf16.msra.mxu1 %v3337_v34 }
0x1a10   :  { %3107 = vmatprep.subr.bf16.mxu1 %v3455_v5 }
0x1a13   :  { %3108 = vmatpush3.bf16.msra.mxu1 %v3338_v35 }
0x1a14   :  { %3109 = vmatprep.subr.bf16.mxu1 %v3455_v5 }
0x1a17   :  { %3110 = vmatpush3.bf16.msra.mxu1 %v3339_v52 }
0x1a18   :  { %3111 = vmatprep.subr.bf16.mxu1 %v3455_v5 }
0x1a1b   :  { %3112 = vmatpush3.bf16.msra.mxu1 %v3340_v51 }
0x1ad1   :  { %v2337_v4 = vpop.f32.mrb[24].mxu1 }
0x1ad2   :  { %v2344_v6 = vadd.f32 %v2337_v4, %v3808_v44  ;;  %v3087_v7 = vpop.f32.mrb[25].mxu1 }
0x1ad3   :  { %v2340_v10 = vpop.f32.mrb[26].mxu1 }
0x1ad4   :  { %v3970_v11 = vadd.f32 %v2349_v3, %v2344_v6  ;;  %v2345_v12 = vadd.f32 %v2340_v10, %v3811_v54  ;;  %v3088_v13 = vpop.f32.mrb[27].mxu1 }
0x1ad6   :  { %v3973_v15 = vadd.f32 %v2349_v3, %v2345_v12  ;;  %v2352_v16 = vsel %vm150_vm9, %v3970_v11, 0.0 }
0x1ad7   :  { %2353 = vadd.xlane.f32.xlu0 %v2352_v16 }
0x1ad8   :  { %v2355_v21 = vsel %vm150_vm9, %v3973_v15, 0.0 }
0x1ad9   :  { %2356 = vadd.xlane.f32.xlu1 %v2355_v21  ;;  %v3341_v21 = vld [vmem:[%s4069_s8] sm:$0xff]  }
0x1b64   :  { %v2354_v40 = vpop.xlane.xlu0 %2353 }
0x1b65   :  { %v2358_v19 = vmul.f32 0.03125, %v2354_v40  ;;  %v3342_v40 = vld [vmem:[%s4069_s8 + $0x8] sm:$0xff]   ;;  %s3471_s8 = smov [#allocation3]  }
0x1b66   :  { %v2357_v44 = vpop.xlane.xlu1 %2356  ;;  %s2662_s19 = sshll.u32 %s3471_s8, 4  ;;  %s2663_s19 = int_to_ptr.vmem [resolvable:$true] %s2662_s19 }
0x1b67   :  { %v2360_v18 = vsub.f32 %v3970_v11, %v2358_v19  ;;  %v2359_v50 = vmul.f32 0.03125, %v2357_v44  ;;  %s3429_s4 = scalar_lea.vmem %s2663_s19, 256  ;;  %p3434_p1 = scmp.lt.s32.totalorder %s2663_s19, %s2663_s19 }
0x1b68   :  { %p3430_p0 = scmp.ne.s32.totalorder %s2663_s19, %s3429_s4  ;;  %p3435_p2 = scmp.lt.s32.totalorder %s3429_s4, %s3429_s4 }
0x1b69   :  { %v2361_v25 = vsub.f32 %v3973_v15, %v2359_v50  ;;  %v2362_v54 = vmul.f32 %v2360_v18, %v2360_v18 }
0x1b6a   :  { %p3436_p3 = por %p3435_p2, %p3434_p1 }
0x1b6b   :  { %v2364_v59 = vsel %vm150_vm9, %v2362_v54, 0.0  ;;  %v2363_v27 = vmul.f32 %v2361_v25, %v2361_v25 }
0x1b6c   :  { %2365 = vadd.xlane.f32.xlu0 %v2364_v59  ;;  %p3437_p4 = pnand %p3436_p3, %p3430_p0 }
0x1b6d   :  { %v2367_v28 = vsel %vm150_vm9, %v2363_v27, 0.0 }
0x1b70   :  { %2368 = vadd.xlane.f32.xlu0 %v2367_v28 }
0x1bf9   :  { %v2366_v36 = vpop.xlane.xlu0 %2365 }
0x1bfa   :  { %v2370_v9 = vmul.f32 0.03125, %v2366_v36 }
0x1bfc   :  { %v2372_v38 = vadd.f32 1e-05, %v2370_v9 }
0x1bfd   :  { %v2369_v39 = vpop.xlane.xlu0 %2368 }
0x1bfe   :  { %v2371_v8 = vmul.f32 0.03125, %v2369_v39  ;;  %3419 = vrsqrt.f32 %v2372_v38 }
0x1c00   :  { %v2373_v41 = vadd.f32 1e-05, %v2371_v8 }
0x1c02   :  { %3421 = vrsqrt.f32 %v2373_v41 }
0x1c08   :  { %v3420_v42 = vpop.eup %3419 }
0x1c09   :  { %v2376_v45 = vmul.f32 %v3420_v42, %v2360_v18 }
0x1c0c   :  { %v3422_v43 = vpop.eup %3421 }
0x1c0d   :  { %v2377_v47 = vmul.f32 %v3422_v43, %v2361_v25 }
0x1c0f   :  { %v2378_v57 = vpack.c.bf16 %v2377_v47, %v2376_v45 }
0x1c11   :  { %3094 = vmatmul.mubr.msk.bf16.vlgmr.msra.gmra.mrb[36].mxu0 %vm150_vm9, %v2378_v57 }
0x1c12   :  { %3121 = vmatprep.mubr.msk.bf16.mxu0 %vm3456_vm1, %v3455_v5  ;;  %3118 = vmatpush3.bf16.msra.mxu0 %v3341_v21 }
0x1c13   :  { %3119 = vmatprep.subr.bf16.mxu0 %v3455_v5  ;;  %v2790_v5 = vld [vmem:[%s4070_s9] ss:$0 sm:$0xff] }
0x1c16   :  { %3120 = vmatpush3.bf16.msra.mxu0 %v3342_v40 }
0x1ce4   :  { %v2437_v46 = vpop.f32.mrb[36].mxu0 }
0x1ce5   :  { %v2438_v55 = vadd.f32 %v2437_v46, %v2387_v53  ;;  %v3095_v24 = vpop.f32.mrb[37].mxu0 }
0x1ce6   :  { %v2440_v20 = vpop.f32.mrb[38].mxu0 }
0x1ce7   :  { %v2441_v56 = vadd.f32 %v2440_v20, %v2387_v53  ;;  %v3096_v48 = vpop.f32.mrb[39].mxu0  ;;  %v2444_v58 = vmax.f32 %v2438_v55, 0.0 }
0x1ce9   :  { %v2445_v60 = vmax.f32 %v2441_v56, 0.0 }
0x1ceb   :  { %v2446_v22 = vpack.c.bf16 %v2445_v60, %v2444_v58 }
0x1ced   :  { %3114 = vmatmul.mubr.bf16.vlgmr.msra.gmra.mrb[28].mxu1 %v2446_v22 }
0x1dc0   :  { %v2546_v61 = vpop.f32.mrb[28].mxu1 }
0x1dc1   :  { %v2553_v62 = vadd.f32 %v2546_v61, %v3970_v11  ;;  %v3115_v63 = vpop.f32.mrb[29].mxu1 }
0x1dc2   :  { %v2549_v17 = vpop.f32.mrb[30].mxu1 }
0x1dc3   :  { %v2554_v26 = vadd.f32 %v2549_v17, %v3973_v15  ;;  %v3116_v0 = vpop.f32.mrb[31].mxu1  ;;  %v2559_v1 = vadd.f32 %v2558_v23, %v2553_v62 }
0x1dc5   :  { %v2561_v3 = vsel %vm150_vm9, %v2559_v1, 0.0  ;;  %v2560_v4 = vadd.f32 %v2558_v23, %v2554_v26 }
0x1dc6   :  { %2562 = vadd.xlane.f32.xlu1 %v2561_v3 }
0x1dc7   :  { %v2564_v6 = vsel %vm150_vm9, %v2560_v4, 0.0 }
0x1dc8   :  { %2565 = vadd.xlane.f32.xlu0 %v2564_v6 }
0x1e53   :  { %v2563_v7 = vpop.xlane.xlu1 %2562 }
0x1e54   :  { %v2567_v49 = vmul.f32 0.03125, %v2563_v7 }
0x1e55   :  { %v2566_v10 = vpop.xlane.xlu0 %2565 }
0x1e56   :  { %v2569_v37 = vsub.f32 %v2559_v1, %v2567_v49  ;;  %v2568_v14 = vmul.f32 0.03125, %v2566_v10 }
0x1e58   :  { %v2570_v12 = vsub.f32 %v2560_v4, %v2568_v14  ;;  %v2571_v11 = vmul.f32 %v2569_v37, %v2569_v37 }
0x1e5a   :  { %v2573_v13 = vsel %vm150_vm9, %v2571_v11, 0.0  ;;  %v2572_v16 = vmul.f32 %v2570_v12, %v2570_v12 }
0x1e5b   :  { %2574 = vadd.xlane.f32.xlu1 %v2573_v13 }
0x1e5c   :  { %v2576_v15 = vsel %vm150_vm9, %v2572_v16, 0.0 }
0x1e5d   :  { %2577 = vadd.xlane.f32.xlu0 %v2576_v15 }
0x1ee8   :  { %v2575_v19 = vpop.xlane.xlu1 %2574 }
0x1ee9   :  { %v2579_v44 = vmul.f32 0.03125, %v2575_v19 }
0x1eea   :  { %v2578_v18 = vpop.xlane.xlu0 %2577 }
0x1eeb   :  { %v2581_v50 = vadd.f32 1e-05, %v2579_v44  ;;  %v2580_v25 = vmul.f32 0.03125, %v2578_v18 }
0x1eed   :  { %3423 = vrsqrt.f32 %v2581_v50  ;;  %v2582_v54 = vadd.f32 1e-05, %v2580_v25 }
0x1eef   :  { %3425 = vrsqrt.f32 %v2582_v54 }
0x1ef7   :  { %v3424_v59 = vpop.eup %3423 }
0x1ef8   :  { %v2585_v28 = vmul.f32 %v3424_v59, %v2569_v37 }
0x1ef9   :  { %v3426_v27 = vpop.eup %3425 }
0x1efa   :  { %v2586_v2 = vmul.f32 %v3426_v27, %v2570_v12 }
0x1efc   :  { %v2587_v29 = vpack.c.bf16 %v2586_v2, %v2585_v28 }
0x1efe   :  { %3122 = vmatmul.mubr.msk.bf16.vlgmr.msra.gmra.mrb[40].mxu0 %vm150_vm9, %v2587_v29 }
0x1fd1   :  { %v2648_v30 = vpop.f32.mrb[40].mxu0 }
0x1fd2   :  { %v2649_v31 = vadd.f32 %v2790_v5, %v2648_v30  ;;  %v3123_v32 = vpop.f32.mrb[41].mxu0 }
0x1fd3   :  { %v2651_v33 = vpop.f32.mrb[42].mxu0 }
0x1fd4   :  { %2655 = vst [vmem:[#allocation3] sm:$0xff] %v2649_v31  ;;  %v2652_v34 = vadd.f32 %v2790_v5, %v2651_v33  ;;  %v3124_v35 = vpop.f32.mrb[43].mxu0 }
0x1fd6   :  { %2656 = vst [vmem:[#allocation3 + $0x8] sm:$0xff] %v2652_v34 }
0x1fd7   :  { %3440 = shalt.err (!%p3437_p4)
}
0x1fd8   :  { %s3441_s21 = scalar_lea.hbm %s4071_s10, 256 }
0x1fd9   :  { %p3442_p5 = scmp.ne.s32.totalorder %s4071_s10, %s3441_s21  ;;  %p3445_p6 = scmp.lt.u32.totalorder %s3441_s21, %s4071_s10 }
0x1fdb   :  { %p3447_p7 = pnand %p3445_p6, %p3442_p5 }
0x1fdd   :  { %3450 = shalt.err (!%p3447_p7)
}
0x1fde   :  { %s3472_s1 = smov 128  }
0x1fdf   :  { %2668 = dma.vmem_to_hbm [thread:$0]  %s2663_s19, 256, %s4071_s10, [#allocation4], %s3472_s1, %s3472_s1, %s3467_s0  }
0x1fe0   :  { %3451 = dma.done.wait [#allocation4], 256  }
0x1fe1   :  { %3452 = vsyncadd [#allocation4], 4294967040 }
0x1fe2   :  { %2672 = vsyncpa [#allocation4], 1 }

</bundles_post_ra>
